<compile_context>
chip_gen: v7x
topology: tpu7x:2x2x1
jax: 0.10.0
libtpu: 0.0.40
codegen_flags: <defaults>
</compile_context>

<pallas_src>
import functools
import re

import jax
import jax.numpy as jnp
from jax import lax
from jax.experimental import pallas as pl
from jax.experimental.pallas import tpu as pltpu

SELU_SCALE = 1.0507009873554804934193349852946
SELU_ALPHA = 1.6732632423543772848170429916717
BN_EPS = 1e-5


def _round_up(x, m):
    return (x + m - 1) // m * m


def _tpu_generation():
    """Best-effort TPU generation (5 / 6 / 7 / ...); 0 if unknown."""
    try:
        kind = jax.devices()[0].device_kind.lower()
    except Exception:
        return 0
    m = re.search(r"(\d+)", kind)
    return int(m.group(1)) if m else 0


_TPU_GEN = _tpu_generation()
# Tile-footprint budget (double-buffered A/B/out/res + acc) and explicit
# scoped-VMEM limit.  v7x has 64 MiB VMEM per TC; v5e/v6e have 128 MiB.
_VMEM_BUDGET = (22 << 20) if _TPU_GEN >= 7 else (44 << 20)
_VMEM_LIMIT = (32 << 20) if _TPU_GEN >= 7 else (64 << 20)

_K_SINGLE_CAP = 4608          # stream K only above this
_TM_MAX = 512
_TK_CANDIDATES = (2048, 1792, 1536, 1280, 1024, 768, 512, 256,   # 256-aligned
                  1152, 896, 640, 384, 128)                       # fallback


# ---------------------------------------------------------------------------
# Pallas kernels: matmul with fused bias (+ residual) + activation epilogue
# ---------------------------------------------------------------------------
def _apply_act(y, act):
    if act == "relu":
        return jnp.maximum(y, 0.0)
    if act == "selu":
        return SELU_SCALE * jnp.where(y > 0, y, SELU_ALPHA * (jnp.exp(y) - 1.0))
    return y


def _mm_single_kernel(*refs, act, has_res):
    # Single K step: no accumulator scratch, compute + epilogue + direct store.
    if has_res:
        a_ref, b_ref, bias_ref, res_ref, o_ref = refs
    else:
        a_ref, b_ref, bias_ref, o_ref = refs
        res_ref = None
    y = jnp.dot(a_ref[...], b_ref[...], preferred_element_type=jnp.float32)
    y = y + bias_ref[...]
    if res_ref is not None:
        y = y + res_ref[...].astype(jnp.float32)
    o_ref[...] = _apply_act(y, act).astype(o_ref.dtype)


def _mm_multi_kernel(*refs, act, has_res):
    # K-streamed path: f32 accumulator persists across the k grid axis.
    if has_res:
        a_ref, b_ref, bias_ref, res_ref, o_ref, acc_ref = refs
    else:
        a_ref, b_ref, bias_ref, o_ref, acc_ref = refs
        res_ref = None
    k = pl.program_id(2)

    @pl.when(k == 0)
    def _():
        acc_ref[...] = jnp.zeros_like(acc_ref)

    acc_ref[...] += jnp.dot(a_ref[...], b_ref[...],
                            preferred_element_type=jnp.float32)

    @pl.when(k == pl.num_programs(2) - 1)
    def _():
        y = acc_ref[...] + bias_ref[...]
        if res_ref is not None:
            y = y + res_ref[...].astype(jnp.float32)
        o_ref[...] = _apply_act(y, act).astype(o_ref.dtype)


# ---------------------------------------------------------------------------
# Shape-adaptive tile selection (all Python level; shapes are static)
# ---------------------------------------------------------------------------
def _vmem_bytes(tm, tn, tk, nk, has_res):
    a = 2 * tm * tk * 2               # bf16, double-buffered
    b = 2 * tk * tn * 2
    bias = 2 * tn * 4
    out = 2 * tm * tn * 2
    res = 2 * tm * tn * 2 if has_res else 0
    acc = tm * tn * 4 if nk > 1 else 0
    return a + b + bias + out + res + acc


def _pick_tiles(M, K, N, has_res):
    # --- N / tn: never pad small channel counts (N < 128) up to a lane tile.
    if N < 128:
        Np, tn = N, N
    else:
        Np = _round_up(N, 128)
        tn_cap = 2048 if M <= 64 else 256        # tiny-M: few, wide j steps
        tn = 128
        for c in (2048, 1024, 768, 512, 384, 256, 128):
            if c <= tn_cap and Np % c == 0:
                tn = c
                break
    # --- M / tm
    tm = min(_TM_MAX, _round_up(M, 8))
    Mp = _round_up(M, tm)
    # --- K / tk (single step whenever reasonable; else 256-aligned tiles)
    if K <= _K_SINGLE_CAP or N < 128:
        Kp, tk = K, K
    else:
        Kp, tk = K, None
        for c in _TK_CANDIDATES:
            if K % c == 0:
                tk = c
                break
        if tk is None:
            Kp, tk = _round_up(K, 512), 512
    nk = Kp // tk
    # --- Dual-TensorCore split: only on v7x, prefer splitting M so the MXU
    #     pass / output stores stay full (>=256) lanes wide.
    if _TPU_GEN >= 7 and Mp == tm and Np == tn:
        if tm >= 16:
            tm //= 2
        elif tn >= 256:
            tn //= 2
    # --- Defensive VMEM-budget guard (tiles above stay well under budget).
    while _vmem_bytes(tm, tn, tk, nk, has_res) > _VMEM_BUDGET:
        if N >= 128 and tn > 128:
            tn //= 2
        elif tk % 512 == 0 and Kp % (tk // 2) == 0:
            tk //= 2
            nk = Kp // tk
        elif tm % 256 == 0:
            tm //= 2
        else:
            break
    return tm, tn, tk, Mp, Np, Kp, nk


# ---------------------------------------------------------------------------
# Fused matmul wrapper
# ---------------------------------------------------------------------------
def matmul_bias_act(a, b, bias, act="none", residual=None,
                    out_dtype=jnp.bfloat16):
    """(M,K) @ (K,N) + bias[1,N] (+ residual[M,N]), fused activation.

    `b` is a pre-transposed, pre-cast bf16 weight matrix and `bias` a
    pre-shaped f32 (1, N) vector (both built once in init_params).
    """
    M, K = a.shape
    _, N = b.shape
    has_res = residual is not None
    tm, tn, tk, Mp, Np, Kp, nk = _pick_tiles(M, K, N, has_res)

    a = a.astype(jnp.bfloat16)
    if (M, K) != (Mp, Kp):
        a = jnp.pad(a, ((0, Mp - M), (0, Kp - K)))
    b = b.astype(jnp.bfloat16)                     # no-op for pre-cast params
    if (K, N) != (Kp, Np):
        b = jnp.pad(b, ((0, Kp - K), (0, Np - N)))
    bias = bias.astype(jnp.float32).reshape(1, N)  # no-op for pre-shaped bias
    if N != Np:
        bias = jnp.pad(bias, ((0, 0), (0, Np - N)))

    inputs = [a, b, bias]
    if nk == 1:
        grid = (Mp // tm, Np // tn)
        in_specs = [
            pl.BlockSpec((tm, Kp), lambda i, j: (i, 0)),
            pl.BlockSpec((Kp, tn), lambda i, j: (0, j)),
            pl.BlockSpec((1, tn), lambda i, j: (0, j)),
        ]
        res_spec = pl.BlockSpec((tm, tn), lambda i, j: (i, j))
        out_spec = pl.BlockSpec((tm, tn), lambda i, j: (i, j))
        semantics = ("parallel", "parallel")
        scratch = ()
        kern = functools.partial(_mm_single_kernel, act=act, has_res=has_res)
    else:
        grid = (Mp // tm, Np // tn, nk)
        in_specs = [
            pl.BlockSpec((tm, tk), lambda i, j, k: (i, k)),
            pl.BlockSpec((tk, tn), lambda i, j, k: (k, j)),
            pl.BlockSpec((1, tn), lambda i, j, k: (0, j)),
        ]
        # TODO(synk): consider pipeline_mode=pl.Buffered(3) on the B spec for
        # the few K-streamed decoder matmuls once verified on this JAX version.
        res_spec = pl.BlockSpec((tm, tn), lambda i, j, k: (i, j))
        out_spec = pl.BlockSpec((tm, tn), lambda i, j, k: (i, j))
        semantics = ("parallel", "parallel", "arbitrary")
        scratch = (pltpu.VMEM((tm, tn), jnp.float32),)
        kern = functools.partial(_mm_multi_kernel, act=act, has_res=has_res)

    if has_res:
        r = residual.astype(jnp.bfloat16)
        if (M, N) != (Mp, Np):
            r = jnp.pad(r, ((0, Mp - M), (0, Np - N)))
        inputs.append(r)
        in_specs.append(res_spec)

    out = pl.pallas_call(
        kern,
        out_shape=jax.ShapeDtypeStruct((Mp, Np), out_dtype),
        grid_spec=pltpu.PrefetchScalarGridSpec(
            num_scalar_prefetch=0,
            grid=grid,
            in_specs=in_specs,
            out_specs=out_spec,
            scratch_shapes=scratch,
        ),
        compiler_params=pltpu.CompilerParams(
            dimension_semantics=semantics,
            vmem_limit_bytes=_VMEM_LIMIT),
    )(*inputs)
    if (M, N) != (Mp, Np):
        out = out[:M, :N]
    return out


# ---------------------------------------------------------------------------
# Conv / pooling / upsample wrappers (im2col glue in JAX, matmul in Pallas)
# ---------------------------------------------------------------------------
@functools.partial(jax.jit,
                   static_argnames=("stride", "pad", "ksize", "act",
                                    "out_dtype"))
def conv2d_act(x, w_mat, bias, residual=None, *, stride, pad, ksize, act,
               out_dtype=jnp.bfloat16):
    """x: NHWC.  w_mat: bf16 (ksize*ksize*Cin, Cout), bias: f32 (1, Cout).

    Optional `residual` (NHWC, same shape as the conv output) is added in the
    matmul epilogue before the activation (fused bottleneck residual path).
    """
    n, h, wd, cin = x.shape
    cout = w_mat.shape[1]
    kh = kw = ksize
    x = x.astype(jnp.bfloat16)
    oh = (h + 2 * pad - kh) // stride + 1
    ow = (wd + 2 * pad - kw) // stride + 1
    if kh == 1 and kw == 1 and stride == 1 and pad == 0:
        a = x.reshape(n * h * wd, cin)              # 1x1 conv: no im2col copy
    else:
        xp = jnp.pad(x, ((0, 0), (pad, pad), (pad, pad), (0, 0))) if pad else x
        cols = [xp[:, i:i + stride * oh:stride, j:j + stride * ow:stride, :]
                for i in range(kh) for j in range(kw)]
        a = jnp.concatenate(cols, axis=-1).reshape(n * oh * ow, kh * kw * cin)
        # TODO(synk): fuse the KH*KW im2col expansion into the matmul kernel
        # (element-offset LHS windows / manual DMA of shifted row slabs) so
        # the ~9x expanded A tensor never hits HBM for 3x3 convs.
    res2 = residual.reshape(n * oh * ow, cout) if residual is not None else None
    y = matmul_bias_act(a, w_mat, bias, act=act, residual=res2,
                        out_dtype=out_dtype)
    return y.reshape(n, oh, ow, cout)


@jax.jit
def maxpool2x2(x):
    n, h, w, c = x.shape
    return x.reshape(n, h // 2, 2, w // 2, 2, c).max(axis=(2, 4))


def _up1d(x, axis):
    """2x bilinear upsample along `axis`, PyTorch align_corners=False."""
    s = x.shape[axis]
    first = lax.slice_in_dim(x, 0, 1, axis=axis)
    last = lax.slice_in_dim(x, s - 1, s, axis=axis)
    prev = jnp.concatenate([first, lax.slice_in_dim(x, 0, s - 1, axis=axis)],
                           axis=axis)
    nxt = jnp.concatenate([lax.slice_in_dim(x, 1, s, axis=axis), last],
                          axis=axis)
    even = 0.25 * prev + 0.75 * x
    odd = 0.75 * x + 0.25 * nxt
    stacked = jnp.stack([even, odd], axis=axis + 1)
    new_shape = list(x.shape)
    new_shape[axis] = 2 * s
    return stacked.reshape(new_shape)


def upsample2x_bilinear(x):  # NHWC, bf16 in / bf16 out
    # TODO(synk): fold the (linear) 2x bilinear upsample into the following
    # 3x3 conv weights (4-phase filter bank on the low-res map); kept in XLA
    # on bf16 data because exact border handling (conv zero-pad interacting
    # with upsample edge-clamp) would change the module's semantics.
    return _up1d(_up1d(x, 1), 2)


# ---------------------------------------------------------------------------
# Deterministic parameter construction (synthetic, PyTorch layouts folded to
# MXU-ready matrices at init time)
# ---------------------------------------------------------------------------
class _KeyGen:
    def __init__(self, key):
        self.key = key
        self.i = 0

    def __call__(self):
        self.i += 1
        return jax.random.fold_in(self.key, self.i)


def _conv_weight(kg, cout, cin, kh, kw):
    fan_in = cin * kh * kw
    std = (2.0 / fan_in) ** 0.5
    return std * jax.random.normal(kg(), (cout, cin, kh, kw), jnp.float32)


def _pack(w, b):
    """(Cout,Cin,KH,KW) f32 -> bf16 (KH*KW*Cin, Cout) + f32 (1, Cout)."""
    cout, cin, kh, kw = w.shape
    wm = jnp.transpose(w, (2, 3, 1, 0)).reshape(kh * kw * cin, cout)
    return wm.astype(jnp.bfloat16), b.astype(jnp.float32).reshape(1, cout)


def _bn_folded_conv(kg, cout, cin, kh, kw):
    """conv(bias=False) + eval-mode BatchNorm, folded and packed."""
    w = _conv_weight(kg, cout, cin, kh, kw)
    gamma = jnp.ones((cout,), jnp.float32)
    beta = 0.01 * jax.random.normal(kg(), (cout,), jnp.float32)
    mean = jnp.zeros((cout,), jnp.float32)
    var = jnp.ones((cout,), jnp.float32)
    s = gamma / jnp.sqrt(var + BN_EPS)
    return _pack(w * s[:, None, None, None], beta - mean * s)


def _biased_conv(kg, cout, cin, kh, kw):
    w = _conv_weight(kg, cout, cin, kh, kw)
    b = 0.01 * jax.random.normal(kg(), (cout,), jnp.float32)
    return _pack(w, b)


def _make_layer(kg, inplanes, planes, blocks, stride):
    layer = []
    for bi in range(blocks):
        s = stride if bi == 0 else 1
        blk = {
            "conv1": _bn_folded_conv(kg, planes, inplanes, 1, 1),
            "conv2": _bn_folded_conv(kg, planes, planes, 3, 3),
            "conv3": _bn_folded_conv(kg, planes * 4, planes, 1, 1),
            "stride": s,
            "downsample": None,
        }
        if s != 1 or inplanes != planes * 4:
            blk["downsample"] = _bn_folded_conv(kg, planes * 4, inplanes, 1, 1)
        layer.append(blk)
        inplanes = planes * 4
    return layer, inplanes


def _decoder_block_params(kg, cin, cmid, cout):
    return {"conv1": _biased_conv(kg, cmid, cin, 3, 3),
            "conv2": _biased_conv(kg, cout, cmid, 3, 3)}


def init_params(seed=0, num_filters=32, num_classes=1):
    kg = _KeyGen(jax.random.PRNGKey(seed))
    p = {"num_classes": num_classes}
    p["conv1"] = _bn_folded_conv(kg, 64, 3, 7, 7)              # resnet conv1+bn1
    inplanes = 64
    p["layer1"], inplanes = _make_layer(kg, inplanes, 64, 3, 1)
    p["layer2"], inplanes = _make_layer(kg, inplanes, 128, 4, 2)
    p["layer3"], inplanes = _make_layer(kg, inplanes, 256, 23, 2)
    p["layer4"], inplanes = _make_layer(kg, inplanes, 512, 3, 2)
    nf = num_filters
    p["center"] = _decoder_block_params(kg, 2048, nf * 8 * 2, nf * 8)
    p["dec5"] = _decoder_block_params(kg, 2048 + nf * 8, nf * 8 * 2, nf * 8)
    p["dec4"] = _decoder_block_params(kg, 1024 + nf * 8, nf * 8 * 2, nf * 8)
    p["dec3"] = _decoder_block_params(kg, 512 + nf * 8, nf * 4 * 2, nf * 2)
    p["dec2"] = _decoder_block_params(kg, 256 + nf * 2, nf * 2 * 2, nf * 2 * 2)
    p["dec1"] = _decoder_block_params(kg, nf * 2 * 2, nf * 2 * 2, nf)
    p["dec0"] = _biased_conv(kg, nf, nf, 3, 3)
    # Final 1x1 conv (Cout = num_classes, typically 1) stays in plain XLA: a
    # 1-lane MXU matmul would waste 127/128 output lanes + a padded HBM pass.
    wf = _conv_weight(kg, num_classes, nf, 1, 1)
    bf = 0.01 * jax.random.normal(kg(), (num_classes,), jnp.float32)
    p["final_w"] = jnp.transpose(wf, (2, 3, 1, 0)).reshape(nf, num_classes)
    p["final_b"] = bf
    return p


# ---------------------------------------------------------------------------
# Forward pass
# ---------------------------------------------------------------------------
def _bottleneck_fwd(x, blk):
    w1, b1 = blk["conv1"]
    out = conv2d_act(x, w1, b1, stride=1, pad=0, ksize=1, act="relu")
    w2, b2 = blk["conv2"]
    out = conv2d_act(out, w2, b2, stride=blk["stride"], pad=1, ksize=3,
                     act="relu")
    if blk["downsample"] is not None:
        wd, bd = blk["downsample"]
        identity = conv2d_act(x, wd, bd, stride=blk["stride"], pad=0, ksize=1,
                              act="none")
    else:
        identity = x
    # conv3 + bias + residual + ReLU fused in one Pallas matmul epilogue.
    w3, b3 = blk["conv3"]
    return conv2d_act(out, w3, b3, identity, stride=1, pad=0, ksize=1,
                      act="relu")


def _run_layer(x, layer):
    for blk in layer:
        x = _bottleneck_fwd(x, blk)
    return x


@jax.jit
def _decoder_block_fwd(x, p):
    # DecoderBlockV2, is_deconv=False: Upsample(2x bilinear) + 2x ConvRelu(SELU)
    x = upsample2x_bilinear(x)
    x = conv2d_act(x, *p["conv1"], stride=1, pad=1, ksize=3, act="selu")
    x = conv2d_act(x, *p["conv2"], stride=1, pad=1, ksize=3, act="selu")
    return x


def resunet101_forward(params, x_nchw):
    x = jnp.transpose(x_nchw, (0, 2, 3, 1))                    # NCHW -> NHWC
    w, b = params["conv1"]
    conv1 = conv2d_act(x, w, b, stride=2, pad=3, ksize=7, act="relu")
    conv1 = maxpool2x2(conv1)                                  # self.pool (2x2)
    conv2 = _run_layer(conv1, params["layer1"])
    conv3 = _run_layer(conv2, params["layer2"])
    conv4 = _run_layer(conv3, params["layer3"])
    conv5 = _run_layer(conv4, params["layer4"])

    center = _decoder_block_fwd(maxpool2x2(conv5), params["center"])
    dec5 = _decoder_block_fwd(jnp.concatenate([center, conv5], -1), params["dec5"])
    dec4 = _decoder_block_fwd(jnp.concatenate([dec5, conv4], -1), params["dec4"])
    dec3 = _decoder_block_fwd(jnp.concatenate([dec4, conv3], -1), params["dec3"])
    dec2 = _decoder_block_fwd(jnp.concatenate([dec3, conv2], -1), params["dec2"])
    dec1 = _decoder_block_fwd(dec2, params["dec1"])
    dec0 = conv2d_act(dec1, *params["dec0"], stride=1, pad=1, ksize=3,
                      act="selu")
    # Final 1x1 conv in plain XLA (f32).
    out = jnp.einsum("nhwc,co->nhwo", dec0.astype(jnp.float32),
                     params["final_w"]) + params["final_b"]
    out = jnp.transpose(out, (0, 3, 1, 2))                     # NHWC -> NCHW
    if params["num_classes"] > 1:
        out = jax.nn.log_softmax(out, axis=1)
    return out


if __name__ == "__main__":
    # Input spatial must be divisible by 64 (encoder /32 + extra pool + decoder).
    key = jax.random.PRNGKey(0)
    x = jax.random.normal(key, (1, 3, 64, 64), jnp.float32)    # NCHW like PyTorch
    params = init_params(seed=0, num_filters=32, num_classes=1)
    out = resunet101_forward(params, x)
    out = jax.block_until_ready(out)
    assert out.shape == (1, 1, 64, 64), out.shape
    assert bool(jnp.all(jnp.isfinite(out)))
    print("KERNEL_OK")
</pallas_src>

<mosaic_0001>
module attributes {stable_mosaic.version = 11 : i64} {
  func.func @_mm_single_kernel(%arg0: i32, %arg1: i32, %arg2: memref<512x147xbf16, #tpu.memory_space<vmem>>, %arg3: memref<147x64xbf16, #tpu.memory_space<vmem>>, %arg4: memref<1x64xf32, #tpu.memory_space<vmem>>, %arg5: memref<512x64xbf16, #tpu.memory_space<vmem>>) attributes {dimension_semantics = [#tpu.dimension_semantics<parallel>, #tpu.dimension_semantics<parallel>], iteration_bounds = array<i64: 2, 1>, scalar_prefetch = 0 : i64, scratch_operands = 0 : i64, tpu.core_type = #tpu.core_type<tc>, window_params = [{transform_indices = @transform_0, window_bounds = array<i64: 512, 147>}, {transform_indices = @transform_1, window_bounds = array<i64: 147, 64>}, {transform_indices = @transform_2, window_bounds = array<i64: 1, 64>}, {transform_indices = @transform_3, window_bounds = array<i64: 512, 64>}]} {
    %c0 = arith.constant 0 : index
    %c0_0 = arith.constant 0 : index
    %0 = vector.load %arg2[%c0, %c0_0] : memref<512x147xbf16, #tpu.memory_space<vmem>>, vector<512x147xbf16>
    %c0_1 = arith.constant 0 : index
    %c0_2 = arith.constant 0 : index
    %1 = vector.load %arg3[%c0_1, %c0_2] : memref<147x64xbf16, #tpu.memory_space<vmem>>, vector<147x64xbf16>
    %cst = arith.constant dense<0.000000e+00> : vector<512x64xf32>
    %2 = tpu.matmul %0, %1, %cst {dimension_numbers = #tpu.dot_dimension_numbers<[1], [0], [0], [1], [0, 0, 1, 1], [], []>} : vector<512x147xbf16>, vector<147x64xbf16>, vector<512x64xf32> -> vector<512x64xf32>
    %c0_3 = arith.constant 0 : index
    %c0_4 = arith.constant 0 : index
    %3 = vector.load %arg4[%c0_3, %c0_4] : memref<1x64xf32, #tpu.memory_space<vmem>>, vector<1x64xf32>
    %4 = vector.broadcast %3 : vector<1x64xf32> to vector<512x64xf32>
    %5 = arith.addf %2, %4 : vector<512x64xf32>
    %cst_5 = arith.constant 0.000000e+00 : f32
    %6 = vector.broadcast %cst_5 : f32 to vector<512x64xf32>
    %7 = arith.maximumf %5, %6 : vector<512x64xf32>
    %8 = arith.truncf %7 : vector<512x64xf32> to vector<512x64xbf16>
    %c0_6 = arith.constant 0 : index
    %c0_7 = arith.constant 0 : index
    %9 = vector.load %arg5[%c0_6, %c0_7] : memref<512x64xbf16, #tpu.memory_space<vmem>>, vector<512x64xbf16>
    tpu.vector_store %arg5[%c0_6, %c0_7], %8 {strides = array<i32>} : memref<512x64xbf16, #tpu.memory_space<vmem>>, vector<512x64xbf16>,
    return
  }
  func.func @transform_0(%arg0: i32, %arg1: i32) -> (i32, i32) {
    %c0_i32 = arith.constant 0 : i32
    %c0_i32_0 = arith.constant 0 : i32
    return %arg0, %c0_i32 : i32, i32
  }
  func.func @transform_1(%arg0: i32, %arg1: i32) -> (i32, i32) {
    %c0_i32 = arith.constant 0 : i32
    %c0_i32_0 = arith.constant 0 : i32
    return %c0_i32, %arg1 : i32, i32
  }
  func.func @transform_2(%arg0: i32, %arg1: i32) -> (i32, i32) {
    %c0_i32 = arith.constant 0 : i32
    %c0_i32_0 = arith.constant 0 : i32
    return %c0_i32, %arg1 : i32, i32
  }
  func.func @transform_3(%arg0: i32, %arg1: i32) -> (i32, i32) {
    %c0_i32 = arith.constant 0 : i32
    return %arg0, %arg1 : i32, i32
  }
}

</mosaic_0001>

<bundles_post_ra>
// kernel: conv2d_act.1
= control target key start
LH: loop header
LB: loop body
LE: loop exit
PB: predicated region body
PF: predicated region fallthrough
CT: control target
= control target key end

     0   :  { %8 = vsyncpa [#allocation3], 0  ;;  %s2815_s0 = inlined_call_operand.hbm [shape: bf16[1024,147], index: 0, kind: input, shape index: {}]   ;;  %s2816_s1 = inlined_call_operand.hbm [shape: bf16[147,64], index: 1, kind: input, shape index: {}]   ;;  %s2817_s2 = inlined_call_operand.hbm [shape: f32[1,64], index: 2, kind: input, shape index: {}]   ;;  %s2818_s3 = inlined_call_operand.hbm [shape: bf16[1024,64], index: 3, kind: output, shape index: {}]  }
   0x1   :  { %10 = vsyncpa [#allocation3 + $0x1], 0 }
   0x2   :  { %11 = vsyncpa [#allocation6], 0 }
   0x3   :  { %12 = vsyncpa [#allocation4], 0 }
   0x4   :  { %14 = vsyncpa [#allocation4 + $0x1], 0  ;;  %s2263_s12 = smov 0   ;;  %s2265_s13 = smov 0  }
   0x5   :  { %s2267_s14 = smov 0   ;;  %s2269_s15 = smov 0  }
   0x6   :  { %s2271_s16 = smov 0   ;;  %s2273_s17 = smov 0  }
   0x7 LB: > { %s1582_s18 = sadd.s32 4294967295, %s2229_s17   ;;  %s1583_s19 = sadd.s32 4294967294, %s2229_s17   ;;  %s2229_s17 = sphi %s2273_s17, %s20_s17   ;;  %s2225_s16 = sphi %s2271_s16, %s2840_s16   ;;  %s2221_s15 = sphi %s2269_s15, %s2839_s15   ;;  %s2217_s14 = sphi %s2267_s14, %s2838_s14   ;;  %s2213_s13 = sphi %s2265_s13, %s2837_s13   ;;  %s2209_s12 = sphi %s2263_s12, %s2836_s12  }
   0x8   : > { %p52_p0 = scmp.ne.s32.totalorder %s2213_s13, %s2209_s12  ;;  %p2297_p1 = scmp.eq.s32.totalorder %s1582_s18, 0 }
   0x9   : > { %p2301_p2 = scmp.eq.s32.totalorder %s1582_s18, 1  ;;  %p136_p3 = scmp.eq.s32.totalorder %s1583_s19, 1 }
   0xa   : > { %s2823_s20 = scalar_select %p2297_p1, 1, 0 }
   0xb   : > { %p2307_p4 = por %p2297_p1, %p52_p0  ;;  %p1584_p5 = scmp.ge.s32.totalorder %s2229_s17, 1 }
   0xc   : > { %p2312_p6 = por %p136_p3, %p52_p0  ;;  %p143_p7 = scmp.lt.s32.totalorder %s2229_s17, 3 }
   0xd   : > { %s2825_s22 = scalar_select %p2307_p4, 1, 0 }
   0xe   : > { %s2826_s23 = scalar_select %p2312_p6, 1, 0 }
   0xf   : > { %p2317_p8 = pnand %p1584_p5, %p143_p7  ;;  %s2231_s25 = smov [#allocation5]  }
  0x10   : > { %s157_s26 = sshll.u32 %s2231_s25, 4  ;;  %s2232_s28 = smov [#allocation7]   ;;  %s2321_s26 = int_to_ptr.vmem [resolvable:$true] %s157_s26 }
  0x11   : > { %p1872_p9 = pneg %p2317_p8  ;;  %s173_s29 = sshll.u32 %s2232_s28, 4  ;;  %s2332_s29 = int_to_ptr.vmem [resolvable:$true] %s173_s29 }
  0x12   : > { %s2057_s5 = scalar_lea.hbm %s2816_s1, 1216 }
  0x13   : > { %p2328_p11 = pnand %p1872_p9, %p2297_p1  ;;  %p2058_p12 = scmp.ne.s32.totalorder %s2816_s1, %s2057_s5 }
  0x14   : > { %p2064_p5 = scmp.lt.u32.totalorder %s2057_s5, %s2816_s1 }
  0x15   : > { %p2059_p13 = pneg %p2328_p11 }
  0x17   : > { %p2060_p0 = pnand %p2059_p13, %p2058_p12 }
  0x19   : > { %p2061_p3 = pneg %p2060_p0 }
  0x1b   : > { %p2066_p7 = pnand %p2064_p5, %p2061_p3 }
  0x1d   : > { %2069 = shalt.err (!%p2066_p7)
}
  0x1e   : > { %s2070_s10 = scalar_lea.vmem %s2321_s26, 1216  ;;  %p2078_p1 = scmp.lt.s32.totalorder %s2321_s26, %s2321_s26 }
  0x1f   : > { %p2071_p9 = scmp.ne.s32.totalorder %s2321_s26, %s2070_s10  ;;  %p2079_p12 = scmp.lt.s32.totalorder %s2070_s10, %s2070_s10 }
  0x21   : > { %p2073_p10 = pnand %p2071_p9, %p2059_p13  ;;  %p2080_p0 = por %p2079_p12, %p2078_p1 }
  0x23   : > { %p2074_p6 = pneg %p2073_p10 }
  0x25   : > { %p2081_p4 = pnand %p2080_p0, %p2074_p6 }
  0x27   : > { %2084 = shalt.err (!%p2081_p4)
}
  0x28   : > { %s2233_s11 = smov 64   ;;  %s2234_s18 = smov 4  }
  0x29   : > { %1875 = dma.hbm_to_vmem [thread:$0]  (!%p2328_p11), %s2816_s1, 1216, %s2321_s26, [#allocation6], %s2233_s11, %s2233_s11, %s2234_s18  }
  0x2a   : > { %s2085_s4 = scalar_lea.hbm %s2817_s2, 16 }
  0x2b   : > { %p2086_p1 = scmp.ne.s32.totalorder %s2817_s2, %s2085_s4  ;;  %p2092_p10 = scmp.lt.u32.totalorder %s2085_s4, %s2817_s2 }
  0x2d   : > { %p2088_p4 = pnand %p2086_p1, %p2059_p13 }
  0x2f   : > { %p2089_p6 = pneg %p2088_p4 }
  0x31   : > { %p2094_p3 = pnand %p2092_p10, %p2089_p6 }
  0x33   : > { %2097 = shalt.err (!%p2094_p3)
}
  0x34   : > { %s2098_s26 = scalar_lea.vmem %s2332_s29, 16  ;;  %s2105_s9 = scalar_lea.vmem %s2332_s29, 32 }
  0x35   : > { %p2099_p5 = scmp.ne.s32.totalorder %s2332_s29, %s2098_s26  ;;  %p2106_p12 = scmp.lt.s32.totalorder %s2332_s29, %s2332_s29 }
  0x36   : > { %p2107_p0 = scmp.lt.s32.totalorder %s2105_s9, %s2098_s26 }
  0x37   : > { %p2101_p7 = pnand %p2099_p5, %p2059_p13 }
  0x38   : > { %p2108_p1 = por %p2107_p0, %p2106_p12 }
  0x39   : > { %p2102_p9 = pneg %p2101_p7 }
  0x3b   : > { %p2109_p4 = pnand %p2108_p1, %p2102_p9 }
  0x3d   : > { %2112 = shalt.err (!%p2109_p4)
}
  0x3e   : > { %1878 = dma.hbm_to_vmem [thread:$0]  (!%p2328_p11), %s2817_s2, 16, %s2332_s29, [#allocation6]  }
  0x3f   : > { %s32_s18 = sadd.s32 1, %s2225_s16  ;;  %s39_s19 = sadd.s32 1, %s2217_s14 }
  0x40   : > { %p34_p13 = scmp.ge.s32.totalorder %s32_s18, 2  ;;  %p46_p6 = scmp.ne.s32.totalorder %s2217_s14, %s2213_s13 }
  0x41   : > { %p47_p10 = scmp.eq.s32.totalorder %s2229_s17, 0  ;;  %p1889_p3 = scmp.lt.s32.totalorder %s2229_s17, 2 }
  0x42   : > { %s2842_s18 = smov (%p34_p13, %s32_s18), 0  ;;  %p2397_p7 = por %p2301_p2, %p46_p6 }
  0x43   : > { %p48_p5 = por %p47_p10, %p46_p6  ;;  %s36_s25 = ssub.s32 %s2225_s16, %s2842_s18 }
  0x44   : > { %s2829_s27 = scalar_select %p2397_p7, 1, 0 }
  0x45   : > { %s184_s28 = sand.u32 1, %s2217_s14   ;;  %p37_p9 = scmp.eq.s32.totalorder %s36_s25, 0 }
  0x46   : > { %s1588_s29 = sshll.u32 %s184_s28, 9  ;;  %s1774_s30 = sshll.u32 %s2225_s16, 13 }
  0x47   : > { %s2406_s4 = scalar_select %p37_p9, %s2217_s14, %s39_s19  }
  0x48   : > { %s2411_s7 = scalar_lea.hbm %s2815_s0, %s1774_s30  ;;  %s188_s21 = scalar_lea.vmem [#allocation2], %s1588_s29 }
  0x49   : > { %s196_s8 = sshll.u32 %s188_s21, 4  ;;  %p2415_p2 = pnand %p1889_p3, %p48_p5  ;;  %s2419_s8 = int_to_ptr.vmem [resolvable:$true] %s196_s8 }
  0x4a   : > { %s2421_s9 = scalar_lea.sflag [#allocation3], %s184_s28  ;;  %s2113_s10 = scalar_lea.hbm %s2411_s7, 8192 }
  0x4b   : > { %p2114_p11 = scmp.ne.s32.totalorder %s2411_s7, %s2113_s10  ;;  %p2115_p12 = pneg %p2415_p2 }
  0x4c   : > { %s2118_s25 = scalar_lea.hbm %s2815_s0, 16384  ;;  %p2119_p4 = scmp.lt.u32.totalorder %s2411_s7, %s2815_s0 }
  0x4d   : > { %p2116_p0 = pnand %p2115_p12, %p2114_p11  ;;  %p2120_p13 = scmp.lt.u32.totalorder %s2118_s25, %s2113_s10 }
  0x4e   : > { %p2122_p10 = scmp.lt.u32.totalorder %s2113_s10, %s2411_s7 }
  0x4f   : > { %p2117_p1 = pneg %p2116_p0  ;;  %p2121_p6 = por %p2120_p13, %p2119_p4 }
  0x51   : > { %p2123_p3 = por %p2122_p10, %p2121_p6 }
  0x53   : > { %p2124_p5 = pnand %p2123_p3, %p2117_p1 }
  0x55   : > { %2127 = shalt.err (!%p2124_p5)
}
  0x56   : > { %s2128_s28 = scalar_lea.vmem %s2419_s8, 8192  ;;  %s2235_s5 = smov [#allocation2]  }
  0x57   : > { %p2129_p9 = scmp.ne.s32.totalorder %s2419_s8, %s2128_s28  ;;  %s2133_s6 = sshll.u32 %s2235_s5, 4  ;;  %s2134_s6 = int_to_ptr.vmem [resolvable:$false] %s2133_s6 }
  0x58   : > { %s2135_s21 = scalar_lea.vmem %s2134_s6, 16384  ;;  %p2136_p7 = scmp.lt.s32.totalorder %s2419_s8, %s2134_s6 }
  0x59   : > { %p2131_p11 = pnand %p2129_p9, %p2115_p12  ;;  %p2137_p4 = scmp.lt.s32.totalorder %s2135_s21, %s2128_s28 }
  0x5b   : > { %p2132_p0 = pneg %p2131_p11  ;;  %p2138_p13 = por %p2137_p4, %p2136_p7 }
  0x5d   : > { %p2139_p6 = pnand %p2138_p13, %p2132_p0 }
  0x5f   : > { %2142 = shalt.err (!%p2139_p6)
}
  0x60   : > { %s2236_s10 = smov 128   ;;  %s2237_s11 = smov 8  }
  0x61   : > { %1882 = dma.hbm_to_vmem [thread:$0]  (!%p2415_p2), %s2411_s7, 8192, %s2419_s8, %s2421_s9, %s2236_s10, %s2236_s10, %s2237_s11  }
  0x62   : > { %208 = sbr.rel (%p2317_p8) target bundleno = 505 (0x1f9), region = 32  ;;  %s2452_s19 = sand.u32 (!%p2317_p8), 1, %s2213_s13  }
  0x63   : > { %s1593_s25 = sshll.u32 (!%p2317_p8), %s2452_s19, 9  ;;  %s211_s29 = scalar_lea.sflag (!%p2317_p8), [#allocation3], %s2452_s19 }
  0x64   : > { %s2456_s30 = scalar_lea.vmem (!%p2317_p8), [#allocation2], %s1593_s25  ;;  %p2831_p7 = scmp.ne.s32.totalorder (!%p2317_p8), %s2825_s22, 0 }
  0x69   : > { %2196 = dma.done.wait (%p2831_p7), %s211_s29, 8192  }
  0x6a   : > { %2198 = vsyncadd (%p2831_p7), %s211_s29, 4294959104  ;;  %p2832_p2 = scmp.ne.s32.totalorder %s2823_s20, 0 }
  0x6c   : > { %2200 = dma.done.wait (%p2832_p2), [#allocation6], 1232  }
  0x6d   : > { %2202 = vsyncadd (%p2832_p2), [#allocation6], 4294966064  ;;  %v2238_v0 = vmov 0   ;;  %v1951_v1 = vld [vmem:[#allocation5] sm:$0xff]   ;;  %v1952_v2 = vld [vmem:[#allocation5 + $0x8] sm:$0xff]   ;;  %vm683_vm0 = vcmask 154624  }
  0x6e   : > { %787 = vmatprep.subr.bf16.mxu0 %v2238_v0  ;;  %1840 = vmatprep.subr.bf16.mxu1 %v2238_v0  ;;  %v1953_v3 = vld [vmem:[#allocation5 + $0x10] sm:$0xff]   ;;  %v1954_v4 = vld [vmem:[#allocation5 + $0x18] sm:$0xff]   ;;  %v1963_v5 = vld [vmem:[%s2456_s30 + $0x4] ss:$8 sps:$4 sm:$0xff]   ;;  %vm780_vm1 = vcmask 1040384   ;;  %vm781_vm2 = vcmask 1041408  }
  0x6f   : > { %788 = vmatpush1.bf16.msra.mxu0 %v1951_v1  ;;  %1850 = vmatpush1.bf16.msra.mxu1 %v1951_v1  ;;  %v1966_v6 = vld [vmem:[%s2456_s30 + $0x104] ss:$8 sps:$4 sm:$0xff]   ;;  %v1957_v9 = vld [vmem:[#allocation5 + $0x30] sm:$0xff]   ;;  %v1958_v10 = vld [vmem:[#allocation5 + $0x38] sm:$0xff]   ;;  %v2239_v11 = vmov 65535   ;;  %s1596_s20 = sshll.u32 %s2452_s19, 8 }
  0x70   : > { %789 = vmatprep.subr.bf16.mxu0 %v2238_v0  ;;  %1841 = vmatprep.subr.bf16.mxu1 %v2238_v0  ;;  %v1955_v7 = vld [vmem:[#allocation5 + $0x20] sm:$0xff]   ;;  %v1956_v8 = vld [vmem:[#allocation5 + $0x28] sm:$0xff]   ;;  %v782_v12 = vsel %vm780_vm1, 4294967295, %v2239_v11  ;;  %v1967_v19 = vld [vmem:[%s2456_s30 + $0x14] ss:$8 sps:$4 sm:$0xff]   ;;  %vm1396_vm3 = vcmask 519168  }
  0x71   : > { %1672 = vmatprep.mubr.msk.bf16.mxu0 %vm683_vm0, %v1963_v5  ;;  %1688 = vmatprep.mubr.msk.bf16.mxu1 %vm683_vm0, %v1966_v6  ;;  %v1959_v13 = vld [vmem:[#allocation5 + $0x40] sm:$0xff]   ;;  %v1960_v14 = vld [vmem:[#allocation5 + $0x48] ss:$0 sps:$4 sm:$0x33]   ;;  %v783_v15 = vsel %vm781_vm2, %v782_v12, 0  ;;  %s2569_s22 = scalar_lea.vmem [#allocation8], %s1596_s20 }
  0x72   : > { %v785_v16 = vand.u32 %v1960_v14, %v783_v15  ;;  %v1961_v17 = vld [vmem:[%s2456_s30] ss:$8 sps:$4 sm:$0xff]   ;;  %v1969_v20 = vld [vmem:[%s2456_s30 + $0x114] ss:$8 sps:$4 sm:$0xff]   ;;  %v1971_v21 = vld [vmem:[%s2456_s30 + $0x10] ss:$8 sps:$4 sm:$0xff]  }
  0x73   : > { %790 = vmatpush1.bf16.msra.mxu0 %v1952_v2  ;;  %1851 = vmatpush1.bf16.msra.mxu1 %v1952_v2  ;;  %v1964_v18 = vld [vmem:[%s2456_s30 + $0x100] ss:$8 sps:$4 sm:$0xff]   ;;  %v1972_v22 = vld [vmem:[%s2456_s30 + $0x110] ss:$8 sps:$4 sm:$0xff]   ;;  %v1973_v23 = vld [vmem:[%s2456_s30 + $0x24] ss:$8 sps:$4 sm:$0xff]  }
  0x74   : > { %791 = vmatprep.subr.bf16.mxu0 %v2238_v0  ;;  %1842 = vmatprep.subr.bf16.mxu1 %v2238_v0  ;;  %v1975_v24 = vld [vmem:[%s2456_s30 + $0x124] ss:$8 sps:$4 sm:$0xff]   ;;  %v1977_v25 = vld [vmem:[%s2456_s30 + $0x20] ss:$8 sps:$4 sm:$0xff]   ;;  %v1979_v27 = vld [vmem:[%s2456_s30 + $0x34] ss:$8 sps:$4 sm:$0xff]  }
  0x75   : > { %v1978_v26 = vld [vmem:[%s2456_s30 + $0x120] ss:$8 sps:$4 sm:$0xff]   ;;  %v1981_v28 = vld [vmem:[%s2456_s30 + $0x134] ss:$8 sps:$4 sm:$0xff]   ;;  %v1983_v29 = vld [vmem:[%s2456_s30 + $0x30] ss:$8 sps:$4 sm:$0xff]  }
  0x76   : > { %v1984_v30 = vld [vmem:[%s2456_s30 + $0x130] ss:$8 sps:$4 sm:$0xff]   ;;  %v1985_v31 = vld [vmem:[%s2456_s30 + $0x44] ss:$8 sps:$4 sm:$0xff]   ;;  %v1989_v33 = vld [vmem:[%s2456_s30 + $0x40] ss:$8 sps:$4 sm:$0xff]  }
  0x77   : > { %792 = vmatpush1.bf16.msra.mxu0 %v1953_v3  ;;  %1852 = vmatpush1.bf16.msra.mxu1 %v1953_v3  ;;  %v1987_v32 = vld [vmem:[%s2456_s30 + $0x144] ss:$8 sps:$4 sm:$0xff]   ;;  %v1990_v34 = vld [vmem:[%s2456_s30 + $0x140] ss:$8 sps:$4 sm:$0xff]   ;;  %v1991_v35 = vld [vmem:[%s2456_s30 + $0x54] ss:$8 sps:$4 sm:$0xff]  }
  0x78   : > { %793 = vmatprep.subr.bf16.mxu0 %v2238_v0  ;;  %1843 = vmatprep.subr.bf16.mxu1 %v2238_v0  ;;  %v1993_v36 = vld [vmem:[%s2456_s30 + $0x154] ss:$8 sps:$4 sm:$0xff]   ;;  %v1995_v37 = vld [vmem:[%s2456_s30 + $0x50] ss:$8 sps:$4 sm:$0xff]   ;;  %v1997_v39 = vld [vmem:[%s2456_s30 + $0x64] ss:$8 sps:$4 sm:$0xff]  }
  0x79   : > { %v1996_v38 = vld [vmem:[%s2456_s30 + $0x150] ss:$8 sps:$4 sm:$0xff]   ;;  %v1999_v40 = vld [vmem:[%s2456_s30 + $0x164] ss:$8 sps:$4 sm:$0xff]   ;;  %v2001_v41 = vld [vmem:[%s2456_s30 + $0x60] ss:$8 sps:$4 sm:$0xff]  }
  0x7a   : > { %v2002_v42 = vld [vmem:[%s2456_s30 + $0x160] ss:$8 sps:$4 sm:$0xff]   ;;  %v2003_v43 = vld [vmem:[%s2456_s30 + $0x74] ss:$8 sps:$4 sm:$0xff]   ;;  %v2007_v45 = vld [vmem:[%s2456_s30 + $0x70] ss:$8 sps:$4 sm:$0xff]  }
  0x7b   : > { %794 = vmatpush1.bf16.msra.mxu0 %v1954_v4  ;;  %1853 = vmatpush1.bf16.msra.mxu1 %v1954_v4  ;;  %v2005_v44 = vld [vmem:[%s2456_s30 + $0x174] ss:$8 sps:$4 sm:$0xff]   ;;  %v2008_v46 = vld [vmem:[%s2456_s30 + $0x170] ss:$8 sps:$4 sm:$0xff]   ;;  %v2009_v47 = vld [vmem:[%s2456_s30 + $0x84] ss:$8 sps:$4 sm:$0xff]  }
  0x7c   : > { %795 = vmatprep.subr.bf16.mxu0 %v2238_v0  ;;  %1844 = vmatprep.subr.bf16.mxu1 %v2238_v0  ;;  %v2011_v48 = vld [vmem:[%s2456_s30 + $0x184] ss:$8 sps:$4 sm:$0xff]   ;;  %v2013_v49 = vld [vmem:[%s2456_s30 + $0x80] ss:$8 sps:$4 sm:$0xff]   ;;  %v2015_v51 = vld [vmem:[%s2456_s30 + $0x94] ss:$8 sps:$4 sm:$0xff]  }
  0x7d   : > { %v2014_v50 = vld [vmem:[%s2456_s30 + $0x180] ss:$8 sps:$4 sm:$0xff]   ;;  %v2017_v52 = vld [vmem:[%s2456_s30 + $0x194] ss:$8 sps:$4 sm:$0xff]   ;;  %v2019_v53 = vld [vmem:[%s2456_s30 + $0x90] ss:$8 sps:$4 sm:$0xff]  }
  0x7e   : > { %v2020_v54 = vld [vmem:[%s2456_s30 + $0x190] ss:$8 sps:$4 sm:$0xff]   ;;  %v2021_v55 = vld [vmem:[%s2456_s30 + $0xa4] ss:$8 sps:$4 sm:$0xff]   ;;  %v2025_v57 = vld [vmem:[%s2456_s30 + $0xa0] ss:$8 sps:$4 sm:$0xff]  }
  0x7f   : > { %796 = vmatpush1.bf16.msra.mxu0 %v1955_v7  ;;  %1854 = vmatpush1.bf16.msra.mxu1 %v1955_v7  ;;  %v2023_v56 = vld [vmem:[%s2456_s30 + $0x1a4] ss:$8 sps:$4 sm:$0xff]   ;;  %v2026_v58 = vld [vmem:[%s2456_s30 + $0x1a0] ss:$8 sps:$4 sm:$0xff]   ;;  %v2027_v59 = vld [vmem:[%s2456_s30 + $0xb4] ss:$8 sps:$4 sm:$0xff]  }
  0x80   : > { %797 = vmatprep.subr.bf16.mxu0 %v2238_v0  ;;  %1845 = vmatprep.subr.bf16.mxu1 %v2238_v0  ;;  %v2029_v60 = vld [vmem:[%s2456_s30 + $0x1b4] ss:$8 sps:$4 sm:$0xff]   ;;  %v2031_v61 = vld [vmem:[%s2456_s30 + $0xb0] ss:$8 sps:$4 sm:$0xff]   ;;  %v2033_v63 = vld [vmem:[%s2456_s30 + $0xc4] ss:$8 sps:$4 sm:$0xff]  }
  0x81   : > { %v2032_v62 = vld [vmem:[%s2456_s30 + $0x1b0] ss:$8 sps:$4 sm:$0xff]   ;;  %v2037_v1 = vld [vmem:[%s2456_s30 + $0xc0] ss:$8 sps:$4 sm:$0xff]   ;;  %v2039_v3 = vld [vmem:[%s2456_s30 + $0xd4] ss:$8 sps:$4 sm:$0xff]  }
  0x82   : > { %v2038_v2 = vld [vmem:[%s2456_s30 + $0x1c0] ss:$8 sps:$4 sm:$0xff]   ;;  %v2041_v4 = vld [vmem:[%s2456_s30 + $0x1d4] ss:$8 sps:$4 sm:$0xff]   ;;  %v2043_v5 = vld [vmem:[%s2456_s30 + $0xd0] ss:$8 sps:$4 sm:$0xff]  }
  0x83   : > { %798 = vmatpush1.bf16.msra.mxu0 %v1956_v8  ;;  %1855 = vmatpush1.bf16.msra.mxu1 %v1956_v8  ;;  %v2044_v6 = vld [vmem:[%s2456_s30 + $0x1d0] ss:$8 sps:$4 sm:$0xff]   ;;  %v2045_v7 = vld [vmem:[%s2456_s30 + $0xe4] ss:$8 sps:$4 sm:$0xff]   ;;  %v2051_v11 = vld [vmem:[%s2456_s30 + $0xf4] ss:$8 sps:$4 sm:$0xff]  }
  0x84   : > { %799 = vmatprep.subr.bf16.mxu0 %v2238_v0  ;;  %1846 = vmatprep.subr.bf16.mxu1 %v2238_v0  ;;  %v2047_v8 = vld [vmem:[%s2456_s30 + $0x1e4] ss:$8 sps:$4 sm:$0xff]   ;;  %v2053_v12 = vld [vmem:[%s2456_s30 + $0x1f4] ss:$8 sps:$4 sm:$0xff]   ;;  %v2056_v14 = vld [vmem:[%s2456_s30 + $0x1f0] ss:$8 sps:$4 sm:$0xff]  }
  0x85   : > { %v2562_v15 = vld [vmem:[#allocation7] ss:$0 sm:$0xff]  ;;  %s1839_s24 = sshll.u32 %s2221_s15, 12  ;;  %s1476_s7 = sshll.u32 %s2569_s22, 4  ;;  %s2758_s7 = int_to_ptr.vmem [resolvable:$true] %s1476_s7 }
  0x86   : > { %s2756_s9 = scalar_lea.hbm %s2818_s3, %s1839_s24  ;;  %s1462_s15 = scalar_lea.sflag [#allocation4], %s2452_s19 }
  0x87   : > { %800 = vmatpush1.bf16.msra.mxu0 %v1957_v9  ;;  %1856 = vmatpush1.bf16.msra.mxu1 %v1957_v9  ;;  %v2049_v9 = vld [vmem:[%s2456_s30 + $0xe0] ss:$8 sps:$4 sm:$0xff]   ;;  %s2143_s28 = scalar_lea.vmem %s2758_s7, 4096  ;;  %p2833_p12 = scmp.ne.s32.totalorder %s2829_s27, 0 }
  0x88   : > { %801 = vmatprep.subr.bf16.mxu0 %v2238_v0  ;;  %1847 = vmatprep.subr.bf16.mxu1 %v2238_v0  ;;  %p2144_p8 = scmp.ne.s32.totalorder %s2758_s7, %s2143_s28  ;;  %s2240_s5 = smov [#allocation8]  }
  0x89   : > { %s2147_s6 = sshll.u32 %s2240_s5, 4  ;;  %s2148_s6 = int_to_ptr.vmem [resolvable:$false] %s2147_s6 }
  0x8a   : > { %p2145_p1 = pnand %p2144_p8, %p2833_p12  ;;  %s2149_s21 = scalar_lea.vmem %s2148_s6, 8192 }
  0x8b   : > { %802 = vmatpush1.bf16.msra.mxu0 %v1958_v10  ;;  %1857 = vmatpush1.bf16.msra.mxu1 %v1958_v10  ;;  %v2050_v10 = vld [vmem:[%s2456_s30 + $0x1e0] ss:$8 sps:$4 sm:$0xff]   ;;  %p2150_p3 = scmp.lt.s32.totalorder %s2758_s7, %s2148_s6  ;;  %p2151_p5 = scmp.lt.s32.totalorder %s2149_s21, %s2143_s28 }
  0x8c   : > { %803 = vmatprep.subr.bf16.mxu0 %v2238_v0  ;;  %1848 = vmatprep.subr.bf16.mxu1 %v2238_v0  ;;  %p2146_p10 = pneg %p2145_p1 }
  0x8d   : > { %p2152_p9 = por %p2151_p5, %p2150_p3 }
  0x8f   : > { %804 = vmatpush1.bf16.msra.mxu0 %v1959_v13  ;;  %1858 = vmatpush1.bf16.msra.mxu1 %v1959_v13  ;;  %v2055_v13 = vld [vmem:[%s2456_s30 + $0xf0] ss:$8 sps:$4 sm:$0xff]   ;;  %p2153_p11 = pnand %p2152_p9, %p2146_p10 }
  0x90   : > { %805 = vmatprep.subr.bf16.mxu0 %v2238_v0  ;;  %1849 = vmatprep.subr.bf16.mxu1 %v2238_v0  ;;  %v2035_v0 = vld [vmem:[%s2456_s30 + $0x1c4] ss:$8 sps:$4 sm:$0xff]  }
  0x93   : > { %806 = vmatpush1.bf16.msra.mxu0 %v785_v16  ;;  %1859 = vmatpush1.bf16.msra.mxu1 %v785_v16 }
  0x96   : > { %820 = vmatmul.mubr.bf16.vlgmr.msra.gmra.mrb[0].mxu0 %v1961_v17  ;;  %948 = vmatmul.mubr.bf16.vlgmr.msra.gmra.mrb[0].mxu1 %v1964_v18 }
  0x97   : > { %1673 = vmatprep.mubr.msk.bf16.mxu0 %vm683_vm0, %v1967_v19  ;;  %1689 = vmatprep.mubr.msk.bf16.mxu1 %vm683_vm0, %v1969_v20 }
  0x9e   : > { %828 = vmatmul.mubr.bf16.gmra.mrb[4].mxu0 %v1971_v21  ;;  %956 = vmatmul.mubr.bf16.gmra.mrb[4].mxu1 %v1972_v22 }
  0x9f   : > { %1674 = vmatprep.mubr.msk.bf16.mxu0 %vm683_vm0, %v1973_v23  ;;  %1690 = vmatprep.mubr.msk.bf16.mxu1 %vm683_vm0, %v1975_v24 }
  0xa6   : > { %836 = vmatmul.mubr.bf16.gmra.mrb[8].mxu0 %v1977_v25  ;;  %964 = vmatmul.mubr.bf16.gmra.mrb[8].mxu1 %v1978_v26 }
  0xa7   : > { %1675 = vmatprep.mubr.msk.bf16.mxu0 %vm683_vm0, %v1979_v27  ;;  %1691 = vmatprep.mubr.msk.bf16.mxu1 %vm683_vm0, %v1981_v28 }
  0xae   : > { %844 = vmatmul.mubr.bf16.gmra.mrb[12].mxu0 %v1983_v29  ;;  %972 = vmatmul.mubr.bf16.gmra.mrb[12].mxu1 %v1984_v30 }
  0xaf   : > { %1676 = vmatprep.mubr.msk.bf16.mxu0 %vm683_vm0, %v1985_v31  ;;  %1692 = vmatprep.mubr.msk.bf16.mxu1 %vm683_vm0, %v1987_v32 }
  0xb6   : > { %852 = vmatmul.mubr.bf16.gmra.mrb[16].mxu0 %v1989_v33  ;;  %980 = vmatmul.mubr.bf16.gmra.mrb[16].mxu1 %v1990_v34 }
  0xb7   : > { %1677 = vmatprep.mubr.msk.bf16.mxu0 %vm683_vm0, %v1991_v35  ;;  %1693 = vmatprep.mubr.msk.bf16.mxu1 %vm683_vm0, %v1993_v36 }
  0xbe   : > { %860 = vmatmul.mubr.bf16.gmra.mrb[20].mxu0 %v1995_v37  ;;  %988 = vmatmul.mubr.bf16.gmra.mrb[20].mxu1 %v1996_v38 }
  0xbf   : > { %1678 = vmatprep.mubr.msk.bf16.mxu0 %vm683_vm0, %v1997_v39  ;;  %1694 = vmatprep.mubr.msk.bf16.mxu1 %vm683_vm0, %v1999_v40 }
  0xc6   : > { %868 = vmatmul.mubr.bf16.gmra.mrb[24].mxu0 %v2001_v41  ;;  %996 = vmatmul.mubr.bf16.gmra.mrb[24].mxu1 %v2002_v42 }
  0xc7   : > { %1679 = vmatprep.mubr.msk.bf16.mxu0 %vm683_vm0, %v2003_v43  ;;  %1695 = vmatprep.mubr.msk.bf16.mxu1 %vm683_vm0, %v2005_v44 }
  0xce   : > { %876 = vmatmul.mubr.bf16.gmra.mrb[28].mxu0 %v2007_v45  ;;  %1004 = vmatmul.mubr.bf16.gmra.mrb[28].mxu1 %v2008_v46 }
  0xcf   : > { %1680 = vmatprep.mubr.msk.bf16.mxu0 %vm683_vm0, %v2009_v47  ;;  %1696 = vmatprep.mubr.msk.bf16.mxu1 %vm683_vm0, %v2011_v48 }
  0xd6   : > { %884 = vmatmul.mubr.bf16.gmra.mrb[32].mxu0 %v2013_v49  ;;  %1012 = vmatmul.mubr.bf16.gmra.mrb[32].mxu1 %v2014_v50 }
  0xd7   : > { %1681 = vmatprep.mubr.msk.bf16.mxu0 %vm683_vm0, %v2015_v51  ;;  %1697 = vmatprep.mubr.msk.bf16.mxu1 %vm683_vm0, %v2017_v52 }
  0xde   : > { %892 = vmatmul.mubr.bf16.gmra.mrb[36].mxu0 %v2019_v53  ;;  %1020 = vmatmul.mubr.bf16.gmra.mrb[36].mxu1 %v2020_v54 }
  0xdf   : > { %1682 = vmatprep.mubr.msk.bf16.mxu0 %vm683_vm0, %v2021_v55  ;;  %1698 = vmatprep.mubr.msk.bf16.mxu1 %vm683_vm0, %v2023_v56 }
  0xe6   : > { %900 = vmatmul.mubr.bf16.gmra.mrb[40].mxu0 %v2025_v57  ;;  %1028 = vmatmul.mubr.bf16.gmra.mrb[40].mxu1 %v2026_v58 }
  0xe7   : > { %1683 = vmatprep.mubr.msk.bf16.mxu0 %vm683_vm0, %v2027_v59  ;;  %1699 = vmatprep.mubr.msk.bf16.mxu1 %vm683_vm0, %v2029_v60 }
  0xee   : > { %908 = vmatmul.mubr.bf16.gmra.mrb[44].mxu0 %v2031_v61  ;;  %1036 = vmatmul.mubr.bf16.gmra.mrb[44].mxu1 %v2032_v62 }
  0xef   : > { %1684 = vmatprep.mubr.msk.bf16.mxu0 %vm683_vm0, %v2033_v63  ;;  %1700 = vmatprep.mubr.msk.bf16.mxu1 %vm683_vm0, %v2035_v0 }
  0xf6   : > { %916 = vmatmul.mubr.bf16.gmra.mrb[48].mxu0 %v2037_v1  ;;  %1044 = vmatmul.mubr.bf16.gmra.mrb[48].mxu1 %v2038_v2 }
  0xf7   : > { %1685 = vmatprep.mubr.msk.bf16.mxu0 %vm683_vm0, %v2039_v3  ;;  %1701 = vmatprep.mubr.msk.bf16.mxu1 %vm683_vm0, %v2041_v4 }
  0xfe   : > { %924 = vmatmul.mubr.bf16.gmra.mrb[52].mxu0 %v2043_v5  ;;  %1052 = vmatmul.mubr.bf16.gmra.mrb[52].mxu1 %v2044_v6 }
  0xff   : > { %1686 = vmatprep.mubr.msk.bf16.mxu0 %vm683_vm0, %v2045_v7  ;;  %1702 = vmatprep.mubr.msk.bf16.mxu1 %vm683_vm0, %v2047_v8 }
 0x106   : > { %932 = vmatmul.mubr.bf16.gmra.mrb[56].mxu0 %v2049_v9  ;;  %1060 = vmatmul.mubr.bf16.gmra.mrb[56].mxu1 %v2050_v10 }
 0x107   : > { %1687 = vmatprep.mubr.msk.bf16.mxu0 %vm683_vm0, %v2051_v11  ;;  %1703 = vmatprep.mubr.msk.bf16.mxu1 %vm683_vm0, %v2053_v12 }
 0x10e   : > { %940 = vmatmul.mubr.bf16.gmra.mrb[60].mxu0 %v2055_v13  ;;  %1068 = vmatmul.mubr.bf16.gmra.mrb[60].mxu1 %v2056_v14 }
 0x169   : > { %v821_v16 = vpop.f32.mrb[0].mxu0  ;;  %v949_v17 = vpop.f32.mrb[0].mxu1 }
 0x16a   : > { %v822_v18 = vadd.f32 %v2562_v15, %v821_v16  ;;  %v950_v19 = vadd.f32 %v2562_v15, %v949_v17  ;;  %v823_v20 = vpop.f32.mrb[1].mxu0  ;;  %v951_v21 = vpop.f32.mrb[1].mxu1 }
 0x16b   : > { %v824_v22 = vpop.f32.mrb[2].mxu0  ;;  %v952_v23 = vpop.f32.mrb[2].mxu1 }
 0x16c   : > { %v1076_v24 = vmax.f32 %v822_v18, 0.0  ;;  %v1108_v25 = vmax.f32 %v950_v19, 0.0  ;;  %v825_v26 = vadd.f32 %v2562_v15, %v824_v22  ;;  %v953_v27 = vadd.f32 %v2562_v15, %v952_v23  ;;  %v826_v28 = vpop.f32.mrb[3].mxu0  ;;  %v954_v29 = vpop.f32.mrb[3].mxu1 }
 0x16e   : > { %v1775_v30 = vpack.c.bf16 %v1076_v24, %v1076_v24  ;;  %v1807_v31 = vpack.c.bf16 %v1108_v25, %v1108_v25  ;;  %v1077_v32 = vmax.f32 %v825_v26, 0.0  ;;  %v1109_v33 = vmax.f32 %v953_v27, 0.0 }
 0x170   : > { %1397 = vst.msk [vmem:[%s2569_s22] sm:$0xf] %vm1396_vm3, %v1775_v30  ;;  %1429 = vst.msk [vmem:[%s2569_s22 + $0x80] sm:$0xf] %vm1396_vm3, %v1807_v31  ;;  %v1776_v34 = vpack.c.bf16 %v1077_v32, %v1077_v32  ;;  %v1808_v35 = vpack.c.bf16 %v1109_v33, %v1109_v33 }
 0x171   : > { %v829_v36 = vpop.f32.mrb[4].mxu0  ;;  %v957_v37 = vpop.f32.mrb[4].mxu1 }
 0x172   : > { %1398 = vst.msk [vmem:[%s2569_s22 + $0x4] sm:$0xf] %vm1396_vm3, %v1776_v34  ;;  %1430 = vst.msk [vmem:[%s2569_s22 + $0x84] sm:$0xf] %vm1396_vm3, %v1808_v35  ;;  %v830_v38 = vadd.f32 %v2562_v15, %v829_v36  ;;  %v958_v39 = vadd.f32 %v2562_v15, %v957_v37  ;;  %v831_v40 = vpop.f32.mrb[5].mxu0  ;;  %v959_v41 = vpop.f32.mrb[5].mxu1 }
 0x173   : > { %v832_v42 = vpop.f32.mrb[6].mxu0  ;;  %v960_v43 = vpop.f32.mrb[6].mxu1 }
 0x174   : > { %v1078_v44 = vmax.f32 %v830_v38, 0.0  ;;  %v1110_v45 = vmax.f32 %v958_v39, 0.0  ;;  %v833_v46 = vadd.f32 %v2562_v15, %v832_v42  ;;  %v961_v47 = vadd.f32 %v2562_v15, %v960_v43  ;;  %v834_v48 = vpop.f32.mrb[7].mxu0  ;;  %v962_v49 = vpop.f32.mrb[7].mxu1 }
 0x176   : > { %v1777_v50 = vpack.c.bf16 %v1078_v44, %v1078_v44  ;;  %v1809_v51 = vpack.c.bf16 %v1110_v45, %v1110_v45  ;;  %v1079_v52 = vmax.f32 %v833_v46, 0.0  ;;  %v1111_v53 = vmax.f32 %v961_v47, 0.0 }
 0x178   : > { %1399 = vst.msk [vmem:[%s2569_s22 + $0x8] sm:$0xf] %vm1396_vm3, %v1777_v50  ;;  %1431 = vst.msk [vmem:[%s2569_s22 + $0x88] sm:$0xf] %vm1396_vm3, %v1809_v51  ;;  %v1778_v54 = vpack.c.bf16 %v1079_v52, %v1079_v52  ;;  %v1810_v55 = vpack.c.bf16 %v1111_v53, %v1111_v53 }
 0x179   : > { %v837_v56 = vpop.f32.mrb[8].mxu0  ;;  %v965_v57 = vpop.f32.mrb[8].mxu1 }
 0x17a   : > { %1400 = vst.msk [vmem:[%s2569_s22 + $0xc] sm:$0xf] %vm1396_vm3, %v1778_v54  ;;  %1432 = vst.msk [vmem:[%s2569_s22 + $0x8c] sm:$0xf] %vm1396_vm3, %v1810_v55  ;;  %v838_v58 = vadd.f32 %v2562_v15, %v837_v56  ;;  %v966_v59 = vadd.f32 %v2562_v15, %v965_v57  ;;  %v839_v60 = vpop.f32.mrb[9].mxu0  ;;  %v967_v61 = vpop.f32.mrb[9].mxu1 }
 0x17b   : > { %v840_v62 = vpop.f32.mrb[10].mxu0  ;;  %v968_v63 = vpop.f32.mrb[10].mxu1 }
 0x17c   : > { %v1080_v0 = vmax.f32 %v838_v58, 0.0  ;;  %v1112_v1 = vmax.f32 %v966_v59, 0.0  ;;  %v841_v2 = vadd.f32 %v2562_v15, %v840_v62  ;;  %v969_v3 = vadd.f32 %v2562_v15, %v968_v63  ;;  %v842_v4 = vpop.f32.mrb[11].mxu0  ;;  %v970_v5 = vpop.f32.mrb[11].mxu1 }
 0x17e   : > { %v1779_v6 = vpack.c.bf16 %v1080_v0, %v1080_v0  ;;  %v1811_v7 = vpack.c.bf16 %v1112_v1, %v1112_v1  ;;  %v1081_v8 = vmax.f32 %v841_v2, 0.0  ;;  %v1113_v9 = vmax.f32 %v969_v3, 0.0 }
 0x180   : > { %1401 = vst.msk [vmem:[%s2569_s22 + $0x10] sm:$0xf] %vm1396_vm3, %v1779_v6  ;;  %1433 = vst.msk [vmem:[%s2569_s22 + $0x90] sm:$0xf] %vm1396_vm3, %v1811_v7  ;;  %v1780_v10 = vpack.c.bf16 %v1081_v8, %v1081_v8  ;;  %v1812_v11 = vpack.c.bf16 %v1113_v9, %v1113_v9 }
 0x181   : > { %v845_v12 = vpop.f32.mrb[12].mxu0  ;;  %v973_v13 = vpop.f32.mrb[12].mxu1 }
 0x182   : > { %1402 = vst.msk [vmem:[%s2569_s22 + $0x14] sm:$0xf] %vm1396_vm3, %v1780_v10  ;;  %1434 = vst.msk [vmem:[%s2569_s22 + $0x94] sm:$0xf] %vm1396_vm3, %v1812_v11  ;;  %v846_v14 = vadd.f32 %v2562_v15, %v845_v12  ;;  %v974_v16 = vadd.f32 %v2562_v15, %v973_v13  ;;  %v847_v17 = vpop.f32.mrb[13].mxu0  ;;  %v975_v18 = vpop.f32.mrb[13].mxu1 }
 0x183   : > { %v848_v19 = vpop.f32.mrb[14].mxu0  ;;  %v976_v20 = vpop.f32.mrb[14].mxu1 }
 0x184   : > { %v1082_v21 = vmax.f32 %v846_v14, 0.0  ;;  %v1114_v22 = vmax.f32 %v974_v16, 0.0  ;;  %v849_v23 = vadd.f32 %v2562_v15, %v848_v19  ;;  %v977_v24 = vadd.f32 %v2562_v15, %v976_v20  ;;  %v850_v25 = vpop.f32.mrb[15].mxu0  ;;  %v978_v26 = vpop.f32.mrb[15].mxu1 }
 0x186   : > { %v1781_v27 = vpack.c.bf16 %v1082_v21, %v1082_v21  ;;  %v1813_v28 = vpack.c.bf16 %v1114_v22, %v1114_v22  ;;  %v1083_v29 = vmax.f32 %v849_v23, 0.0  ;;  %v1115_v30 = vmax.f32 %v977_v24, 0.0 }
 0x188   : > { %1403 = vst.msk [vmem:[%s2569_s22 + $0x18] sm:$0xf] %vm1396_vm3, %v1781_v27  ;;  %1435 = vst.msk [vmem:[%s2569_s22 + $0x98] sm:$0xf] %vm1396_vm3, %v1813_v28  ;;  %v1782_v31 = vpack.c.bf16 %v1083_v29, %v1083_v29  ;;  %v1814_v32 = vpack.c.bf16 %v1115_v30, %v1115_v30 }
 0x189   : > { %v853_v33 = vpop.f32.mrb[16].mxu0  ;;  %v981_v34 = vpop.f32.mrb[16].mxu1 }
 0x18a   : > { %1404 = vst.msk [vmem:[%s2569_s22 + $0x1c] sm:$0xf] %vm1396_vm3, %v1782_v31  ;;  %1436 = vst.msk [vmem:[%s2569_s22 + $0x9c] sm:$0xf] %vm1396_vm3, %v1814_v32  ;;  %v854_v35 = vadd.f32 %v2562_v15, %v853_v33  ;;  %v982_v36 = vadd.f32 %v2562_v15, %v981_v34  ;;  %v855_v37 = vpop.f32.mrb[17].mxu0  ;;  %v983_v38 = vpop.f32.mrb[17].mxu1 }
 0x18b   : > { %v856_v39 = vpop.f32.mrb[18].mxu0  ;;  %v984_v40 = vpop.f32.mrb[18].mxu1 }
 0x18c   : > { %v1084_v41 = vmax.f32 %v854_v35, 0.0  ;;  %v1116_v42 = vmax.f32 %v982_v36, 0.0  ;;  %v857_v43 = vadd.f32 %v2562_v15, %v856_v39  ;;  %v985_v44 = vadd.f32 %v2562_v15, %v984_v40  ;;  %v858_v45 = vpop.f32.mrb[19].mxu0  ;;  %v986_v46 = vpop.f32.mrb[19].mxu1 }
 0x18e   : > { %v1783_v47 = vpack.c.bf16 %v1084_v41, %v1084_v41  ;;  %v1815_v48 = vpack.c.bf16 %v1116_v42, %v1116_v42  ;;  %v1085_v49 = vmax.f32 %v857_v43, 0.0  ;;  %v1117_v50 = vmax.f32 %v985_v44, 0.0 }
 0x190   : > { %1405 = vst.msk [vmem:[%s2569_s22 + $0x20] sm:$0xf] %vm1396_vm3, %v1783_v47  ;;  %1437 = vst.msk [vmem:[%s2569_s22 + $0xa0] sm:$0xf] %vm1396_vm3, %v1815_v48  ;;  %v1784_v51 = vpack.c.bf16 %v1085_v49, %v1085_v49  ;;  %v1816_v52 = vpack.c.bf16 %v1117_v50, %v1117_v50 }
 0x191   : > { %v861_v53 = vpop.f32.mrb[20].mxu0  ;;  %v989_v54 = vpop.f32.mrb[20].mxu1 }
 0x192   : > { %1406 = vst.msk [vmem:[%s2569_s22 + $0x24] sm:$0xf] %vm1396_vm3, %v1784_v51  ;;  %1438 = vst.msk [vmem:[%s2569_s22 + $0xa4] sm:$0xf] %vm1396_vm3, %v1816_v52  ;;  %v862_v55 = vadd.f32 %v2562_v15, %v861_v53  ;;  %v990_v56 = vadd.f32 %v2562_v15, %v989_v54  ;;  %v863_v57 = vpop.f32.mrb[21].mxu0  ;;  %v991_v58 = vpop.f32.mrb[21].mxu1 }
 0x193   : > { %v864_v59 = vpop.f32.mrb[22].mxu0  ;;  %v992_v60 = vpop.f32.mrb[22].mxu1 }
 0x194   : > { %v1086_v61 = vmax.f32 %v862_v55, 0.0  ;;  %v1118_v62 = vmax.f32 %v990_v56, 0.0  ;;  %v865_v63 = vadd.f32 %v2562_v15, %v864_v59  ;;  %v993_v0 = vadd.f32 %v2562_v15, %v992_v60  ;;  %v866_v1 = vpop.f32.mrb[23].mxu0  ;;  %v994_v2 = vpop.f32.mrb[23].mxu1 }
 0x196   : > { %v1785_v3 = vpack.c.bf16 %v1086_v61, %v1086_v61  ;;  %v1817_v4 = vpack.c.bf16 %v1118_v62, %v1118_v62  ;;  %v1087_v5 = vmax.f32 %v865_v63, 0.0  ;;  %v1119_v6 = vmax.f32 %v993_v0, 0.0 }
 0x198   : > { %1407 = vst.msk [vmem:[%s2569_s22 + $0x28] sm:$0xf] %vm1396_vm3, %v1785_v3  ;;  %1439 = vst.msk [vmem:[%s2569_s22 + $0xa8] sm:$0xf] %vm1396_vm3, %v1817_v4  ;;  %v1786_v7 = vpack.c.bf16 %v1087_v5, %v1087_v5  ;;  %v1818_v8 = vpack.c.bf16 %v1119_v6, %v1119_v6 }
 0x199   : > { %v869_v9 = vpop.f32.mrb[24].mxu0  ;;  %v997_v10 = vpop.f32.mrb[24].mxu1 }
 0x19a   : > { %1408 = vst.msk [vmem:[%s2569_s22 + $0x2c] sm:$0xf] %vm1396_vm3, %v1786_v7  ;;  %1440 = vst.msk [vmem:[%s2569_s22 + $0xac] sm:$0xf] %vm1396_vm3, %v1818_v8  ;;  %v870_v11 = vadd.f32 %v2562_v15, %v869_v9  ;;  %v998_v12 = vadd.f32 %v2562_v15, %v997_v10  ;;  %v871_v13 = vpop.f32.mrb[25].mxu0  ;;  %v999_v14 = vpop.f32.mrb[25].mxu1 }
 0x19b   : > { %v872_v16 = vpop.f32.mrb[26].mxu0  ;;  %v1000_v17 = vpop.f32.mrb[26].mxu1 }
 0x19c   : > { %v1088_v18 = vmax.f32 %v870_v11, 0.0  ;;  %v1120_v19 = vmax.f32 %v998_v12, 0.0  ;;  %v873_v20 = vadd.f32 %v2562_v15, %v872_v16  ;;  %v1001_v21 = vadd.f32 %v2562_v15, %v1000_v17  ;;  %v874_v22 = vpop.f32.mrb[27].mxu0  ;;  %v1002_v23 = vpop.f32.mrb[27].mxu1 }
 0x19e   : > { %v1787_v24 = vpack.c.bf16 %v1088_v18, %v1088_v18  ;;  %v1819_v25 = vpack.c.bf16 %v1120_v19, %v1120_v19  ;;  %v1089_v26 = vmax.f32 %v873_v20, 0.0  ;;  %v1121_v27 = vmax.f32 %v1001_v21, 0.0 }
 0x1a0   : > { %1409 = vst.msk [vmem:[%s2569_s22 + $0x30] sm:$0xf] %vm1396_vm3, %v1787_v24  ;;  %1441 = vst.msk [vmem:[%s2569_s22 + $0xb0] sm:$0xf] %vm1396_vm3, %v1819_v25  ;;  %v1788_v28 = vpack.c.bf16 %v1089_v26, %v1089_v26  ;;  %v1820_v29 = vpack.c.bf16 %v1121_v27, %v1121_v27 }
 0x1a1   : > { %v877_v30 = vpop.f32.mrb[28].mxu0  ;;  %v1005_v31 = vpop.f32.mrb[28].mxu1 }
 0x1a2   : > { %1410 = vst.msk [vmem:[%s2569_s22 + $0x34] sm:$0xf] %vm1396_vm3, %v1788_v28  ;;  %1442 = vst.msk [vmem:[%s2569_s22 + $0xb4] sm:$0xf] %vm1396_vm3, %v1820_v29  ;;  %v878_v32 = vadd.f32 %v2562_v15, %v877_v30  ;;  %v1006_v33 = vadd.f32 %v2562_v15, %v1005_v31  ;;  %v879_v34 = vpop.f32.mrb[29].mxu0  ;;  %v1007_v35 = vpop.f32.mrb[29].mxu1 }
 0x1a3   : > { %v880_v36 = vpop.f32.mrb[30].mxu0  ;;  %v1008_v37 = vpop.f32.mrb[30].mxu1 }
 0x1a4   : > { %v1090_v38 = vmax.f32 %v878_v32, 0.0  ;;  %v1122_v39 = vmax.f32 %v1006_v33, 0.0  ;;  %v881_v40 = vadd.f32 %v2562_v15, %v880_v36  ;;  %v1009_v41 = vadd.f32 %v2562_v15, %v1008_v37  ;;  %v882_v42 = vpop.f32.mrb[31].mxu0  ;;  %v1010_v43 = vpop.f32.mrb[31].mxu1 }
 0x1a6   : > { %v1789_v44 = vpack.c.bf16 %v1090_v38, %v1090_v38  ;;  %v1821_v45 = vpack.c.bf16 %v1122_v39, %v1122_v39  ;;  %v1091_v46 = vmax.f32 %v881_v40, 0.0  ;;  %v1123_v47 = vmax.f32 %v1009_v41, 0.0 }
 0x1a8   : > { %1411 = vst.msk [vmem:[%s2569_s22 + $0x38] sm:$0xf] %vm1396_vm3, %v1789_v44  ;;  %1443 = vst.msk [vmem:[%s2569_s22 + $0xb8] sm:$0xf] %vm1396_vm3, %v1821_v45  ;;  %v1790_v48 = vpack.c.bf16 %v1091_v46, %v1091_v46  ;;  %v1822_v49 = vpack.c.bf16 %v1123_v47, %v1123_v47 }
 0x1a9   : > { %v885_v50 = vpop.f32.mrb[32].mxu0  ;;  %v1013_v51 = vpop.f32.mrb[32].mxu1 }
 0x1aa   : > { %1412 = vst.msk [vmem:[%s2569_s22 + $0x3c] sm:$0xf] %vm1396_vm3, %v1790_v48  ;;  %1444 = vst.msk [vmem:[%s2569_s22 + $0xbc] sm:$0xf] %vm1396_vm3, %v1822_v49  ;;  %v886_v52 = vadd.f32 %v2562_v15, %v885_v50  ;;  %v1014_v53 = vadd.f32 %v2562_v15, %v1013_v51  ;;  %v887_v54 = vpop.f32.mrb[33].mxu0  ;;  %v1015_v55 = vpop.f32.mrb[33].mxu1 }
 0x1ab   : > { %v888_v56 = vpop.f32.mrb[34].mxu0  ;;  %v1016_v57 = vpop.f32.mrb[34].mxu1 }
 0x1ac   : > { %v1092_v58 = vmax.f32 %v886_v52, 0.0  ;;  %v1124_v59 = vmax.f32 %v1014_v53, 0.0  ;;  %v889_v60 = vadd.f32 %v2562_v15, %v888_v56  ;;  %v1017_v61 = vadd.f32 %v2562_v15, %v1016_v57  ;;  %v890_v62 = vpop.f32.mrb[35].mxu0  ;;  %v1018_v63 = vpop.f32.mrb[35].mxu1 }
 0x1ae   : > { %v1791_v0 = vpack.c.bf16 %v1092_v58, %v1092_v58  ;;  %v1823_v1 = vpack.c.bf16 %v1124_v59, %v1124_v59  ;;  %v1093_v2 = vmax.f32 %v889_v60, 0.0  ;;  %v1125_v3 = vmax.f32 %v1017_v61, 0.0 }
 0x1b0   : > { %1413 = vst.msk [vmem:[%s2569_s22 + $0x40] sm:$0xf] %vm1396_vm3, %v1791_v0  ;;  %1445 = vst.msk [vmem:[%s2569_s22 + $0xc0] sm:$0xf] %vm1396_vm3, %v1823_v1  ;;  %v1792_v4 = vpack.c.bf16 %v1093_v2, %v1093_v2  ;;  %v1824_v5 = vpack.c.bf16 %v1125_v3, %v1125_v3 }
 0x1b1   : > { %v893_v6 = vpop.f32.mrb[36].mxu0  ;;  %v1021_v7 = vpop.f32.mrb[36].mxu1 }
 0x1b2   : > { %1414 = vst.msk [vmem:[%s2569_s22 + $0x44] sm:$0xf] %vm1396_vm3, %v1792_v4  ;;  %1446 = vst.msk [vmem:[%s2569_s22 + $0xc4] sm:$0xf] %vm1396_vm3, %v1824_v5  ;;  %v894_v8 = vadd.f32 %v2562_v15, %v893_v6  ;;  %v1022_v9 = vadd.f32 %v2562_v15, %v1021_v7  ;;  %v895_v10 = vpop.f32.mrb[37].mxu0  ;;  %v1023_v11 = vpop.f32.mrb[37].mxu1 }
 0x1b3   : > { %v896_v12 = vpop.f32.mrb[38].mxu0  ;;  %v1024_v13 = vpop.f32.mrb[38].mxu1 }
 0x1b4   : > { %v1094_v14 = vmax.f32 %v894_v8, 0.0  ;;  %v1126_v16 = vmax.f32 %v1022_v9, 0.0  ;;  %v897_v17 = vadd.f32 %v2562_v15, %v896_v12  ;;  %v1025_v18 = vadd.f32 %v2562_v15, %v1024_v13  ;;  %v898_v19 = vpop.f32.mrb[39].mxu0  ;;  %v1026_v20 = vpop.f32.mrb[39].mxu1 }
 0x1b6   : > { %v1793_v21 = vpack.c.bf16 %v1094_v14, %v1094_v14  ;;  %v1825_v22 = vpack.c.bf16 %v1126_v16, %v1126_v16  ;;  %v1095_v23 = vmax.f32 %v897_v17, 0.0  ;;  %v1127_v24 = vmax.f32 %v1025_v18, 0.0 }
 0x1b8   : > { %1415 = vst.msk [vmem:[%s2569_s22 + $0x48] sm:$0xf] %vm1396_vm3, %v1793_v21  ;;  %1447 = vst.msk [vmem:[%s2569_s22 + $0xc8] sm:$0xf] %vm1396_vm3, %v1825_v22  ;;  %v1794_v25 = vpack.c.bf16 %v1095_v23, %v1095_v23  ;;  %v1826_v26 = vpack.c.bf16 %v1127_v24, %v1127_v24 }
 0x1b9   : > { %v901_v27 = vpop.f32.mrb[40].mxu0  ;;  %v1029_v28 = vpop.f32.mrb[40].mxu1 }
 0x1ba   : > { %1416 = vst.msk [vmem:[%s2569_s22 + $0x4c] sm:$0xf] %vm1396_vm3, %v1794_v25  ;;  %1448 = vst.msk [vmem:[%s2569_s22 + $0xcc] sm:$0xf] %vm1396_vm3, %v1826_v26  ;;  %v902_v29 = vadd.f32 %v2562_v15, %v901_v27  ;;  %v1030_v30 = vadd.f32 %v2562_v15, %v1029_v28  ;;  %v903_v31 = vpop.f32.mrb[41].mxu0  ;;  %v1031_v32 = vpop.f32.mrb[41].mxu1 }
 0x1bb   : > { %v904_v33 = vpop.f32.mrb[42].mxu0  ;;  %v1032_v34 = vpop.f32.mrb[42].mxu1 }
 0x1bc   : > { %v1096_v35 = vmax.f32 %v902_v29, 0.0  ;;  %v1128_v36 = vmax.f32 %v1030_v30, 0.0  ;;  %v905_v37 = vadd.f32 %v2562_v15, %v904_v33  ;;  %v1033_v38 = vadd.f32 %v2562_v15, %v1032_v34  ;;  %v906_v39 = vpop.f32.mrb[43].mxu0  ;;  %v1034_v40 = vpop.f32.mrb[43].mxu1 }
 0x1be   : > { %v1795_v41 = vpack.c.bf16 %v1096_v35, %v1096_v35  ;;  %v1827_v42 = vpack.c.bf16 %v1128_v36, %v1128_v36  ;;  %v1097_v43 = vmax.f32 %v905_v37, 0.0  ;;  %v1129_v44 = vmax.f32 %v1033_v38, 0.0 }
 0x1c0   : > { %1417 = vst.msk [vmem:[%s2569_s22 + $0x50] sm:$0xf] %vm1396_vm3, %v1795_v41  ;;  %1449 = vst.msk [vmem:[%s2569_s22 + $0xd0] sm:$0xf] %vm1396_vm3, %v1827_v42  ;;  %v1796_v45 = vpack.c.bf16 %v1097_v43, %v1097_v43  ;;  %v1828_v46 = vpack.c.bf16 %v1129_v44, %v1129_v44 }
 0x1c1   : > { %v909_v47 = vpop.f32.mrb[44].mxu0  ;;  %v1037_v48 = vpop.f32.mrb[44].mxu1 }
 0x1c2   : > { %1418 = vst.msk [vmem:[%s2569_s22 + $0x54] sm:$0xf] %vm1396_vm3, %v1796_v45  ;;  %1450 = vst.msk [vmem:[%s2569_s22 + $0xd4] sm:$0xf] %vm1396_vm3, %v1828_v46  ;;  %v910_v49 = vadd.f32 %v2562_v15, %v909_v47  ;;  %v1038_v50 = vadd.f32 %v2562_v15, %v1037_v48  ;;  %v911_v51 = vpop.f32.mrb[45].mxu0  ;;  %v1039_v52 = vpop.f32.mrb[45].mxu1 }
 0x1c3   : > { %v912_v53 = vpop.f32.mrb[46].mxu0  ;;  %v1040_v54 = vpop.f32.mrb[46].mxu1 }
 0x1c4   : > { %v1098_v55 = vmax.f32 %v910_v49, 0.0  ;;  %v1130_v56 = vmax.f32 %v1038_v50, 0.0  ;;  %v913_v57 = vadd.f32 %v2562_v15, %v912_v53  ;;  %v1041_v58 = vadd.f32 %v2562_v15, %v1040_v54  ;;  %v914_v59 = vpop.f32.mrb[47].mxu0  ;;  %v1042_v60 = vpop.f32.mrb[47].mxu1 }
 0x1c6   : > { %v1797_v61 = vpack.c.bf16 %v1098_v55, %v1098_v55  ;;  %v1829_v62 = vpack.c.bf16 %v1130_v56, %v1130_v56  ;;  %v1099_v63 = vmax.f32 %v913_v57, 0.0  ;;  %v1131_v0 = vmax.f32 %v1041_v58, 0.0 }
 0x1c8   : > { %1419 = vst.msk [vmem:[%s2569_s22 + $0x58] sm:$0xf] %vm1396_vm3, %v1797_v61  ;;  %1451 = vst.msk [vmem:[%s2569_s22 + $0xd8] sm:$0xf] %vm1396_vm3, %v1829_v62  ;;  %v1798_v1 = vpack.c.bf16 %v1099_v63, %v1099_v63  ;;  %v1830_v2 = vpack.c.bf16 %v1131_v0, %v1131_v0 }
 0x1c9   : > { %v917_v3 = vpop.f32.mrb[48].mxu0  ;;  %v1045_v4 = vpop.f32.mrb[48].mxu1 }
 0x1ca   : > { %1420 = vst.msk [vmem:[%s2569_s22 + $0x5c] sm:$0xf] %vm1396_vm3, %v1798_v1  ;;  %1452 = vst.msk [vmem:[%s2569_s22 + $0xdc] sm:$0xf] %vm1396_vm3, %v1830_v2  ;;  %v918_v5 = vadd.f32 %v2562_v15, %v917_v3  ;;  %v1046_v6 = vadd.f32 %v2562_v15, %v1045_v4  ;;  %v919_v7 = vpop.f32.mrb[49].mxu0  ;;  %v1047_v8 = vpop.f32.mrb[49].mxu1 }
 0x1cb   : > { %v920_v9 = vpop.f32.mrb[50].mxu0  ;;  %v1048_v10 = vpop.f32.mrb[50].mxu1 }
 0x1cc   : > { %v1100_v11 = vmax.f32 %v918_v5, 0.0  ;;  %v1132_v12 = vmax.f32 %v1046_v6, 0.0  ;;  %v921_v13 = vadd.f32 %v2562_v15, %v920_v9  ;;  %v1049_v14 = vadd.f32 %v2562_v15, %v1048_v10  ;;  %v922_v16 = vpop.f32.mrb[51].mxu0  ;;  %v1050_v17 = vpop.f32.mrb[51].mxu1 }
 0x1ce   : > { %v1799_v18 = vpack.c.bf16 %v1100_v11, %v1100_v11  ;;  %v1831_v19 = vpack.c.bf16 %v1132_v12, %v1132_v12  ;;  %v1101_v20 = vmax.f32 %v921_v13, 0.0  ;;  %v1133_v21 = vmax.f32 %v1049_v14, 0.0 }
 0x1d0   : > { %1421 = vst.msk [vmem:[%s2569_s22 + $0x60] sm:$0xf] %vm1396_vm3, %v1799_v18  ;;  %1453 = vst.msk [vmem:[%s2569_s22 + $0xe0] sm:$0xf] %vm1396_vm3, %v1831_v19  ;;  %v1800_v22 = vpack.c.bf16 %v1101_v20, %v1101_v20  ;;  %v1832_v23 = vpack.c.bf16 %v1133_v21, %v1133_v21 }
 0x1d1   : > { %v925_v24 = vpop.f32.mrb[52].mxu0  ;;  %v1053_v25 = vpop.f32.mrb[52].mxu1 }
 0x1d2   : > { %1422 = vst.msk [vmem:[%s2569_s22 + $0x64] sm:$0xf] %vm1396_vm3, %v1800_v22  ;;  %1454 = vst.msk [vmem:[%s2569_s22 + $0xe4] sm:$0xf] %vm1396_vm3, %v1832_v23  ;;  %v926_v26 = vadd.f32 %v2562_v15, %v925_v24  ;;  %v1054_v27 = vadd.f32 %v2562_v15, %v1053_v25  ;;  %v927_v28 = vpop.f32.mrb[53].mxu0  ;;  %v1055_v29 = vpop.f32.mrb[53].mxu1 }
 0x1d3   : > { %v928_v30 = vpop.f32.mrb[54].mxu0  ;;  %v1056_v31 = vpop.f32.mrb[54].mxu1 }
 0x1d4   : > { %v1102_v32 = vmax.f32 %v926_v26, 0.0  ;;  %v1134_v33 = vmax.f32 %v1054_v27, 0.0  ;;  %v929_v34 = vadd.f32 %v2562_v15, %v928_v30  ;;  %v1057_v35 = vadd.f32 %v2562_v15, %v1056_v31  ;;  %v930_v36 = vpop.f32.mrb[55].mxu0  ;;  %v1058_v37 = vpop.f32.mrb[55].mxu1 }
 0x1d6   : > { %v1801_v38 = vpack.c.bf16 %v1102_v32, %v1102_v32  ;;  %v1833_v39 = vpack.c.bf16 %v1134_v33, %v1134_v33  ;;  %v1103_v40 = vmax.f32 %v929_v34, 0.0  ;;  %v1135_v41 = vmax.f32 %v1057_v35, 0.0 }
 0x1d8   : > { %1423 = vst.msk [vmem:[%s2569_s22 + $0x68] sm:$0xf] %vm1396_vm3, %v1801_v38  ;;  %1455 = vst.msk [vmem:[%s2569_s22 + $0xe8] sm:$0xf] %vm1396_vm3, %v1833_v39  ;;  %v1802_v42 = vpack.c.bf16 %v1103_v40, %v1103_v40  ;;  %v1834_v43 = vpack.c.bf16 %v1135_v41, %v1135_v41 }
 0x1d9   : > { %v933_v44 = vpop.f32.mrb[56].mxu0  ;;  %v1061_v45 = vpop.f32.mrb[56].mxu1 }
 0x1da   : > { %1424 = vst.msk [vmem:[%s2569_s22 + $0x6c] sm:$0xf] %vm1396_vm3, %v1802_v42  ;;  %1456 = vst.msk [vmem:[%s2569_s22 + $0xec] sm:$0xf] %vm1396_vm3, %v1834_v43  ;;  %v934_v46 = vadd.f32 %v2562_v15, %v933_v44  ;;  %v1062_v47 = vadd.f32 %v2562_v15, %v1061_v45  ;;  %v935_v48 = vpop.f32.mrb[57].mxu0  ;;  %v1063_v49 = vpop.f32.mrb[57].mxu1 }
 0x1db   : > { %v936_v50 = vpop.f32.mrb[58].mxu0  ;;  %v1064_v51 = vpop.f32.mrb[58].mxu1 }
 0x1dc   : > { %v1104_v52 = vmax.f32 %v934_v46, 0.0  ;;  %v1136_v53 = vmax.f32 %v1062_v47, 0.0  ;;  %v937_v54 = vadd.f32 %v2562_v15, %v936_v50  ;;  %v1065_v55 = vadd.f32 %v2562_v15, %v1064_v51  ;;  %v938_v56 = vpop.f32.mrb[59].mxu0  ;;  %v1066_v57 = vpop.f32.mrb[59].mxu1 }
 0x1de   : > { %v1803_v58 = vpack.c.bf16 %v1104_v52, %v1104_v52  ;;  %v1835_v59 = vpack.c.bf16 %v1136_v53, %v1136_v53  ;;  %v1105_v60 = vmax.f32 %v937_v54, 0.0  ;;  %v1137_v61 = vmax.f32 %v1065_v55, 0.0 }
 0x1e0   : > { %1425 = vst.msk [vmem:[%s2569_s22 + $0x70] sm:$0xf] %vm1396_vm3, %v1803_v58  ;;  %1457 = vst.msk [vmem:[%s2569_s22 + $0xf0] sm:$0xf] %vm1396_vm3, %v1835_v59  ;;  %v1804_v62 = vpack.c.bf16 %v1105_v60, %v1105_v60  ;;  %v1836_v63 = vpack.c.bf16 %v1137_v61, %v1137_v61 }
 0x1e1   : > { %v941_v0 = vpop.f32.mrb[60].mxu0  ;;  %v1069_v1 = vpop.f32.mrb[60].mxu1 }
 0x1e2   : > { %1426 = vst.msk [vmem:[%s2569_s22 + $0x74] sm:$0xf] %vm1396_vm3, %v1804_v62  ;;  %1458 = vst.msk [vmem:[%s2569_s22 + $0xf4] sm:$0xf] %vm1396_vm3, %v1836_v63  ;;  %v942_v2 = vadd.f32 %v2562_v15, %v941_v0  ;;  %v1070_v3 = vadd.f32 %v2562_v15, %v1069_v1  ;;  %v943_v4 = vpop.f32.mrb[61].mxu0  ;;  %v1071_v5 = vpop.f32.mrb[61].mxu1 }
 0x1e3   : > { %v944_v6 = vpop.f32.mrb[62].mxu0  ;;  %v1072_v7 = vpop.f32.mrb[62].mxu1 }
 0x1e4   : > { %v1106_v8 = vmax.f32 %v942_v2, 0.0  ;;  %v1138_v9 = vmax.f32 %v1070_v3, 0.0  ;;  %v945_v10 = vadd.f32 %v2562_v15, %v944_v6  ;;  %v1073_v11 = vadd.f32 %v2562_v15, %v1072_v7  ;;  %v946_v12 = vpop.f32.mrb[63].mxu0  ;;  %v1074_v13 = vpop.f32.mrb[63].mxu1 }
 0x1e6   : > { %v1805_v14 = vpack.c.bf16 %v1106_v8, %v1106_v8  ;;  %v1837_v16 = vpack.c.bf16 %v1138_v9, %v1138_v9  ;;  %v1107_v17 = vmax.f32 %v945_v10, 0.0  ;;  %v1139_v18 = vmax.f32 %v1073_v11, 0.0 }
 0x1e8   : > { %1427 = vst.msk [vmem:[%s2569_s22 + $0x78] sm:$0xf] %vm1396_vm3, %v1805_v14  ;;  %1459 = vst.msk [vmem:[%s2569_s22 + $0xf8] sm:$0xf] %vm1396_vm3, %v1837_v16  ;;  %v1806_v15 = vpack.c.bf16 %v1107_v17, %v1107_v17  ;;  %v1838_v19 = vpack.c.bf16 %v1139_v18, %v1139_v18 }
 0x1ea   : > { %1428 = vst.msk [vmem:[%s2569_s22 + $0x7c] sm:$0xf] %vm1396_vm3, %v1806_v15  ;;  %1460 = vst.msk [vmem:[%s2569_s22 + $0xfc] sm:$0xf] %vm1396_vm3, %v1838_v19 }
 0x1eb   : > { %2156 = shalt.err (!%p2153_p11)
}
 0x1ec   : > { %s2157_s10 = scalar_lea.hbm %s2756_s9, 4096  ;;  %s2161_s29 = scalar_lea.hbm %s2818_s3, 8192 }
 0x1ed   : > { %p2158_p0 = scmp.ne.s32.totalorder %s2756_s9, %s2157_s10  ;;  %p2162_p6 = scmp.lt.u32.totalorder %s2756_s9, %s2818_s3 }
 0x1ee   : > { %p2163_p7 = scmp.lt.u32.totalorder %s2161_s29, %s2157_s10  ;;  %p2165_p8 = scmp.lt.u32.totalorder %s2157_s10, %s2756_s9 }
 0x1ef   : > { %p2159_p4 = pnand %p2158_p0, %p2833_p12 }
 0x1f0   : > { %p2164_p2 = por %p2163_p7, %p2162_p6 }
 0x1f1   : > { %p2160_p13 = pneg %p2159_p4 }
 0x1f2   : > { %p2166_p1 = por %p2165_p8, %p2164_p2 }
 0x1f4   : > { %p2167_p10 = pnand %p2166_p1, %p2160_p13 }
 0x1f6   : > { %2170 = shalt.err (!%p2167_p10)
}
 0x1f7   : > { %s2241_s22 = smov 64   ;;  %s2242_s24 = smov 4  }
 0x1f8   : > { %1870 = dma.vmem_to_hbm [thread:$0]  (%p2833_p12), %s2758_s7, 4096, %s2756_s9, %s1462_s15, %s2241_s22, %s2241_s22, %s2242_s24  }
 0x1f9 PF: > { %s1491_s8 = sand.u32 1, %s2209_s12   ;;  %p2834_p3 = scmp.ne.s32.totalorder %s2826_s23, 0 }
 0x1fa   : > { %p2835_p5 = scmp.ge.s32.totalorder %s2229_s17, 2  ;;  %s1492_s26 = scalar_lea.sflag [#allocation4], %s1491_s8 }
 0x1fc   : > { %p1884_p9 = pnand %p2835_p5, %p2834_p3 }
 0x1fe   : > { %2204 = dma.done.wait (!%p1884_p9), %s1492_s26, 4096  }
 0x1ff   : > { %2206 = vsyncadd (!%p1884_p9), %s1492_s26, 4294963200  ;;  %s20_s17 = sadd.s32 1, %s2229_s17   ;;  %s2836_s12 = smov %s2213_s13 }
 0x200   : > { %p17_p11 = scmp.ge.s32.totalorder %s20_s17, 4   ;;  %s2837_s13 = smov %s2217_s14 }
 0x201   : > { %s2838_s14 = smov %s2406_s4  ;;  %s2839_s15 = smov %s2225_s16 }
 0x202   : > { %s2840_s16 = smov %s2842_s18  ;;  %19 = sbr.rel (!%p17_p11) target bundleno = 7 (0x7), region = 87 }
 0x209   :  { %1497 = vsyncpa [#allocation3], 1 }
 0x20a   :  { %1499 = vsyncpa [#allocation3 + $0x1], 1 }
 0x20b   :  { %1500 = vsyncpa [#allocation6], 1 }
 0x20c   :  { %1501 = vsyncpa [#allocation4], 1 }
 0x20d   :  { %1503 = vsyncpa [#allocation4 + $0x1], 1 }

</bundles_post_ra>
